<compile_context>
chip_gen: v6e
topology: v6e:2x2x1
jax: 0.10.0
libtpu: 0.0.40
codegen_flags: <defaults>
</compile_context>

<pallas_src>
import numpy as np
import jax
import jax.numpy as jnp
from jax import lax
from jax.experimental import pallas as pl
from jax.experimental.pallas import tpu as pltpu


# --------------------------- fused forward kernel --------------------------- #
def make_fused_kernel(L, T, B, H, O):
    """Refs: (gx0, W_stack, bias_rest, w_dec_t, b_dec,   # inputs
              out2d, h_final, c_final,                   # outputs
              hseq_sc)                                   # VMEM scratch"""
    G = 4 * H

    def kernel(gx0_ref, w_ref, brest_ref, wdec_ref, bdec_ref,
               out_ref, h_ref, c_ref, hseq_sc):
        # ---- hoisted constants (emitted once; loop below is fully unrolled) ----
        W_blk = [w_ref[m] for m in range(L)]                       # each (H, L*G)
        b_rest = jnp.broadcast_to(brest_ref[...], (B, L * G))      # layer>=1 biases

        # g-lane tanh trick: tanh(x) = 2*sigmoid(2x) - 1 on the g-gate lanes,
        # via precomputed per-lane scale/offset (no per-step selects/broadcasts).
        lane = lax.broadcasted_iota(jnp.int32, (B, G), 1)
        is_g = jnp.logical_and(lane >= 2 * H, lane < 3 * H)
        g_scale = jnp.where(is_g, 2.0, 1.0)
        g_off = jnp.where(is_g, 1.0, 0.0)

        h = [jnp.zeros((B, H), jnp.float32) for _ in range(L)]
        c = [jnp.zeros((B, H), jnp.float32) for _ in range(L)]

        # ---- layer wavefront: step s computes layer l at time t = s - l ----
        for s in range(T + L - 1):
            # recurrent (hidden -> gates) projection for ALL layers at once
            gates_all = b_rest                                     # (B, L*G)
            for m in range(L):
                gates_all = gates_all + jnp.dot(
                    h[m], W_blk[m], preferred_element_type=jnp.float32)

            for l in range(L):
                t_l = s - l
                if 0 <= t_l < T:                                   # static mask
                    g_slab = gates_all[:, l * G:(l + 1) * G]       # (B, 4H)
                    if l == 0:
                        # precomputed embedding->gates rows for this timestep
                        g_slab = g_slab + gx0_ref[pl.ds(t_l * B, B), :]
                    act = jax.nn.sigmoid(g_slab * g_scale) * g_scale - g_off
                    i_g = act[:, 0 * H:1 * H]
                    f_g = act[:, 1 * H:2 * H]
                    g_g = act[:, 2 * H:3 * H]
                    o_g = act[:, 3 * H:4 * H]
                    c[l] = f_g * c[l] + i_g * g_g
                    h[l] = o_g * jnp.tanh(c[l])
                    if l == L - 1:
                        # stage last-layer h for the hoisted decoder (off crit path)
                        hseq_sc[pl.ds(t_l * B, B), :] = h[l]

            del gates_all

        # ---- decoder hoisted out of the recurrence: one matmul + one bulk store ----
        logits = (jnp.dot(hseq_sc[...], wdec_ref[...],
                          preferred_element_type=jnp.float32)
                  + bdec_ref[...])                                 # (T*B, O)
        out_ref[...] = logits.astype(out_ref.dtype)

        for l in range(L):
            h_ref[l] = h[l]
            c_ref[l] = c[l]

    return kernel


# ------------------------------ wrapper (glue) ------------------------------ #
def next_character_lstm_forward(tokens, kp):
    """tokens: (B, T) int32.
    Returns (output (B, O, T), (hidden (B, L, H), cell (B, L, H)))."""
    B, T = tokens.shape
    L, H, O = kp["L"], kp["H"], kp["O"]
    G = 4 * H

    # Embedding folded into layer-0 input projection: gather of (vocab, 4H) rows.
    gx0 = kp["table0"][tokens]                          # (B, T, 4H) -- XLA gather
    gx0 = jnp.transpose(gx0, (1, 0, 2)).reshape(T * B, G)   # row t*B+b, lane-dense

    kernel = make_fused_kernel(L, T, B, H, O)
    out2d, h_lbh, c_lbh = pl.pallas_call(
        kernel,
        out_shape=(jax.ShapeDtypeStruct((T * B, O), jnp.float32),
                   jax.ShapeDtypeStruct((L, B, H), jnp.float32),
                   jax.ShapeDtypeStruct((L, B, H), jnp.float32)),
        in_specs=[pl.BlockSpec(memory_space=pltpu.MemorySpace.VMEM)] * 5,
        out_specs=(pl.BlockSpec(memory_space=pltpu.MemorySpace.VMEM),
                   pl.BlockSpec(memory_space=pltpu.MemorySpace.VMEM),
                   pl.BlockSpec(memory_space=pltpu.MemorySpace.VMEM)),
        scratch_shapes=[pltpu.VMEM((T * B, H), jnp.float32)],
    )(gx0, kp["W_stack"], kp["bias_rest"], kp["w_dec_t"], kp["b_dec"])

    output = jnp.transpose(out2d.reshape(T, B, O), (1, 2, 0))   # (B, O, T)
    hidden = jnp.transpose(h_lbh, (1, 0, 2))                    # (B, L, H)
    cell = jnp.transpose(c_lbh, (1, 0, 2))                      # (B, L, H)
    return output, (hidden, cell)


# ----------------------------- parameter prep ------------------------------ #
def prepare_kernel_params(raw):
    """PyTorch-layout params -> fused kernel layout.

    table0[v]    = emb[v] @ w_ih0.T + b_ih0 + b_hh0              (vocab, 4H)
    W_stack[m]   = block row for carry h[m]:
                     cols m*4H:(m+1)*4H   = w_hh_m.T
                     cols (m+1)*4H:(m+2)*4H = w_ih_{m+1}.T        (H, L*4H)
    bias_rest    = [0 | b_ih_1+b_hh_1 | ...]                      (1, L*4H)
    """
    emb = np.asarray(raw["embedding"], np.float32)
    lstm = [tuple(np.asarray(a, np.float32) for a in layer) for layer in raw["lstm"]]
    L = len(lstm)
    H = lstm[0][1].shape[1]
    G = 4 * H

    w_ih0, _, b_ih0, b_hh0 = lstm[0]
    table0 = emb @ w_ih0.T + (b_ih0 + b_hh0)            # (vocab, 4H)

    W_stack = np.zeros((L, H, L * G), np.float32)
    bias_rest = np.zeros((1, L * G), np.float32)
    for m in range(L):
        W_stack[m, :, m * G:(m + 1) * G] = lstm[m][1].T           # w_hh_m.T
        if m + 1 < L:
            W_stack[m, :, (m + 1) * G:(m + 2) * G] = lstm[m + 1][0].T  # w_ih_{m+1}.T
    for l in range(1, L):
        bias_rest[0, l * G:(l + 1) * G] = lstm[l][2] + lstm[l][3]

    w_dec, b_dec = (np.asarray(a, np.float32) for a in raw["decoder"])
    return {
        "table0": jnp.asarray(table0),
        "W_stack": jnp.asarray(W_stack),
        "bias_rest": jnp.asarray(bias_rest),
        "w_dec_t": jnp.asarray(w_dec.T),
        "b_dec": jnp.asarray(b_dec.reshape(1, -1)),
        "L": L, "H": H, "O": w_dec.shape[0],
    }


# ----------------------------- reference (JAX) ------------------------------ #
def reference_forward(tokens, raw):
    emb = raw["embedding"]
    x = jnp.transpose(emb[tokens], (1, 0, 2))           # (T, B, E)
    h_finals, c_finals = [], []
    for (w_ih, w_hh, b_ih, b_hh) in raw["lstm"]:
        H = w_hh.shape[1]
        B = x.shape[1]

        def step(carry, x_t, w_ih=w_ih, w_hh=w_hh, b_ih=b_ih, b_hh=b_hh, H=H):
            h, c = carry
            gates = x_t @ w_ih.T + h @ w_hh.T + b_ih + b_hh
            i = jax.nn.sigmoid(gates[:, 0 * H:1 * H])
            f = jax.nn.sigmoid(gates[:, 1 * H:2 * H])
            g = jnp.tanh(gates[:, 2 * H:3 * H])
            o = jax.nn.sigmoid(gates[:, 3 * H:4 * H])
            c_new = f * c + i * g
            h_new = o * jnp.tanh(c_new)
            return (h_new, c_new), h_new

        (h_f, c_f), ys = lax.scan(step, (jnp.zeros((B, H)), jnp.zeros((B, H))), x)
        x = ys
        h_finals.append(h_f)
        c_finals.append(c_f)
    w_dec, b_dec = raw["decoder"]
    out = x @ w_dec.T + b_dec                           # (T, B, O)
    output = jnp.transpose(out, (1, 2, 0))
    hidden = jnp.transpose(jnp.stack(h_finals, 0), (1, 0, 2))
    cell = jnp.transpose(jnp.stack(c_finals, 0), (1, 0, 2))
    return output, (hidden, cell)


# ----------------------------------- main ----------------------------------- #
if __name__ == "__main__":
    input_size = 16    # vocab size
    embed_size = 32
    hidden_size = 32
    output_size = 16
    n_layers = 2
    batch = 2
    seq_len = 8

    key = jax.random.PRNGKey(0)
    ks = iter(jax.random.split(key, 64))
    bound = 1.0 / np.sqrt(hidden_size)

    raw = {}
    raw["embedding"] = jax.random.normal(next(ks), (input_size, embed_size),
                                         jnp.float32)
    lstm_raw = []
    for layer in range(n_layers):
        in_dim = embed_size if layer == 0 else hidden_size
        w_ih = jax.random.uniform(next(ks), (4 * hidden_size, in_dim),
                                  jnp.float32, -bound, bound)
        w_hh = jax.random.uniform(next(ks), (4 * hidden_size, hidden_size),
                                  jnp.float32, -bound, bound)
        b_ih = jax.random.uniform(next(ks), (4 * hidden_size,), jnp.float32,
                                  -bound, bound)
        b_hh = jax.random.uniform(next(ks), (4 * hidden_size,), jnp.float32,
                                  -bound, bound)
        lstm_raw.append((w_ih, w_hh, b_ih, b_hh))
    raw["lstm"] = lstm_raw

    w_dec = jax.random.uniform(next(ks), (output_size, hidden_size),
                               jnp.float32, -bound, bound)
    b_dec = jax.random.uniform(next(ks), (output_size,), jnp.float32,
                               -bound, bound)
    raw["decoder"] = (w_dec, b_dec)

    kparams = prepare_kernel_params(raw)
    tokens = jax.random.randint(next(ks), (batch, seq_len), 0, input_size,
                                jnp.int32)

    out, (hidden, cell) = next_character_lstm_forward(tokens, kparams)
    jax.block_until_ready((out, hidden, cell))

    # sanity check against a pure-JAX reference (raw PyTorch-layout params)
    ref_out, (ref_h, ref_c) = reference_forward(tokens, raw)
    assert out.shape == (batch, output_size, seq_len)
    assert hidden.shape == (batch, n_layers, hidden_size)
    assert cell.shape == (batch, n_layers, hidden_size)
    np.testing.assert_allclose(np.asarray(out), np.asarray(ref_out),
                               rtol=1e-4, atol=1e-4)
    np.testing.assert_allclose(np.asarray(hidden), np.asarray(ref_h),
                               rtol=1e-4, atol=1e-4)
    np.testing.assert_allclose(np.asarray(cell), np.asarray(ref_c),
                               rtol=1e-4, atol=1e-4)

    print("KERNEL_OK")
</pallas_src>

<mosaic_0001>
module attributes {stable_mosaic.version = 11 : i64} {
  func.func @kernel(%arg0: memref<16x128xf32, #tpu.memory_space<vmem>>, %arg1: memref<2x32x256xf32, #tpu.memory_space<vmem>>, %arg2: memref<1x256xf32, #tpu.memory_space<vmem>>, %arg3: memref<32x16xf32, #tpu.memory_space<vmem>>, %arg4: memref<1x16xf32, #tpu.memory_space<vmem>>, %arg5: memref<16x16xf32, #tpu.memory_space<vmem>>, %arg6: memref<2x2x32xf32, #tpu.memory_space<vmem>>, %arg7: memref<2x2x32xf32, #tpu.memory_space<vmem>>, %arg8: memref<16x32xf32, #tpu.memory_space<vmem>>) attributes {dimension_semantics = [], scalar_prefetch = 0 : i64, scratch_operands = 1 : i64, tpu.core_type = #tpu.core_type<tc>} {
    %c0 = arith.constant 0 : index
    %c0_0 = arith.constant 0 : index
    %c0_1 = arith.constant 0 : index
    %0 = vector.load %arg1[%c0, %c0_0, %c0_1] : memref<2x32x256xf32, #tpu.memory_space<vmem>>, vector<1x32x256xf32>
    %1 = vector.shape_cast %0 : vector<1x32x256xf32> to vector<32x256xf32>
    %c1 = arith.constant 1 : index
    %c0_2 = arith.constant 0 : index
    %c0_3 = arith.constant 0 : index
    %2 = vector.load %arg1[%c1, %c0_2, %c0_3] : memref<2x32x256xf32, #tpu.memory_space<vmem>>, vector<1x32x256xf32>
    %3 = vector.shape_cast %2 : vector<1x32x256xf32> to vector<32x256xf32>
    %c0_4 = arith.constant 0 : index
    %c0_5 = arith.constant 0 : index
    %4 = vector.load %arg2[%c0_4, %c0_5] : memref<1x256xf32, #tpu.memory_space<vmem>>, vector<1x256xf32>
    %5 = vector.shape_cast %4 : vector<1x256xf32> to vector<1x256xf32>
    %6 = vector.broadcast %5 : vector<1x256xf32> to vector<2x256xf32>
    %7 = tpu.iota {dimensions = array<i32: 1>} : vector<2x128xi32>
    %c64_i32 = arith.constant 64 : i32
    %8 = vector.broadcast %c64_i32 : i32 to vector<2x128xi32>
    %9 = arith.cmpi sge, %7, %8 : vector<2x128xi32>
    %c96_i32 = arith.constant 96 : i32
    %10 = vector.broadcast %c96_i32 : i32 to vector<2x128xi32>
    %11 = arith.cmpi slt, %7, %10 : vector<2x128xi32>
    %12 = arith.andi %9, %11 : vector<2x128xi1>
    %cst = arith.constant 2.000000e+00 : f32
    %cst_6 = arith.constant 1.000000e+00 : f32
    %13 = vector.broadcast %cst : f32 to vector<2x128xf32>
    %14 = vector.broadcast %cst_6 : f32 to vector<2x128xf32>
    %15 = arith.select %12, %13, %14 : vector<2x128xi1>, vector<2x128xf32>
    %cst_7 = arith.constant 1.000000e+00 : f32
    %cst_8 = arith.constant 0.000000e+00 : f32
    %16 = vector.broadcast %cst_7 : f32 to vector<2x128xf32>
    %17 = vector.broadcast %cst_8 : f32 to vector<2x128xf32>
    %18 = arith.select %12, %16, %17 : vector<2x128xi1>, vector<2x128xf32>
    %cst_9 = arith.constant 0.000000e+00 : f32
    %19 = vector.broadcast %cst_9 : f32 to vector<2x32xf32>
    %cst_10 = arith.constant 0.000000e+00 : f32
    %20 = vector.broadcast %cst_10 : f32 to vector<2x32xf32>
    %cst_11 = arith.constant 0.000000e+00 : f32
    %21 = vector.broadcast %cst_11 : f32 to vector<2x32xf32>
    %cst_12 = arith.constant 0.000000e+00 : f32
    %22 = vector.broadcast %cst_12 : f32 to vector<2x32xf32>
    %cst_13 = arith.constant dense<0.000000e+00> : vector<2x256xf32>
    %23 = tpu.matmul %19, %1, %cst_13 {dimension_numbers = #tpu.dot_dimension_numbers<[1], [0], [0], [1], [0, 0, 1, 1], [], []>} : vector<2x32xf32>, vector<32x256xf32>, vector<2x256xf32> -> vector<2x256xf32>
    %24 = arith.addf %6, %23 : vector<2x256xf32>
    %cst_14 = arith.constant dense<0.000000e+00> : vector<2x256xf32>
    %25 = tpu.matmul %20, %3, %cst_14 {dimension_numbers = #tpu.dot_dimension_numbers<[1], [0], [0], [1], [0, 0, 1, 1], [], []>} : vector<2x32xf32>, vector<32x256xf32>, vector<2x256xf32> -> vector<2x256xf32>
    %26 = arith.addf %24, %25 : vector<2x256xf32>
    %27 = vector.extract_strided_slice %26 {offsets = [0, 0], sizes = [2, 128], strides = [1, 1]} : vector<2x256xf32> to vector<2x128xf32>
    %c0_15 = arith.constant 0 : index
    %c0_16 = arith.constant 0 : index
    %28 = vector.load %arg0[%c0_15, %c0_16] : memref<16x128xf32, #tpu.memory_space<vmem>>, vector<2x128xf32>
    %29 = arith.addf %27, %28 : vector<2x128xf32>
    %30 = arith.mulf %29, %15 : vector<2x128xf32>
    %31 = arith.negf %30 : vector<2x128xf32>
    %32 = math.exp %31 : vector<2x128xf32>
    %cst_17 = arith.constant 1.000000e+00 : f32
    %33 = vector.broadcast %cst_17 : f32 to vector<2x128xf32>
    %34 = arith.addf %33, %32 : vector<2x128xf32>
    %35 = arith.divf %33, %34 : vector<2x128xf32>
    %36 = arith.mulf %35, %15 : vector<2x128xf32>
    %37 = arith.subf %36, %18 : vector<2x128xf32>
    %38 = vector.extract_strided_slice %37 {offsets = [0, 0], sizes = [2, 32], strides = [1, 1]} : vector<2x128xf32> to vector<2x32xf32>
    %39 = vector.extract_strided_slice %37 {offsets = [0, 32], sizes = [2, 32], strides = [1, 1]} : vector<2x128xf32> to vector<2x32xf32>
    %40 = vector.extract_strided_slice %37 {offsets = [0, 64], sizes = [2, 32], strides = [1, 1]} : vector<2x128xf32> to vector<2x32xf32>
    %41 = vector.extract_strided_slice %37 {offsets = [0, 96], sizes = [2, 32], strides = [1, 1]} : vector<2x128xf32> to vector<2x32xf32>
    %42 = arith.mulf %39, %21 : vector<2x32xf32>
    %43 = arith.mulf %38, %40 : vector<2x32xf32>
    %44 = arith.addf %42, %43 : vector<2x32xf32>
    %45 = math.tanh %44 : vector<2x32xf32>
    %46 = arith.mulf %41, %45 : vector<2x32xf32>
    %cst_18 = arith.constant dense<0.000000e+00> : vector<2x256xf32>
    %47 = tpu.matmul %46, %1, %cst_18 {dimension_numbers = #tpu.dot_dimension_numbers<[1], [0], [0], [1], [0, 0, 1, 1], [], []>} : vector<2x32xf32>, vector<32x256xf32>, vector<2x256xf32> -> vector<2x256xf32>
    %48 = arith.addf %6, %47 : vector<2x256xf32>
    %cst_19 = arith.constant dense<0.000000e+00> : vector<2x256xf32>
    %49 = tpu.matmul %20, %3, %cst_19 {dimension_numbers = #tpu.dot_dimension_numbers<[1], [0], [0], [1], [0, 0, 1, 1], [], []>} : vector<2x32xf32>, vector<32x256xf32>, vector<2x256xf32> -> vector<2x256xf32>
    %50 = arith.addf %48, %49 : vector<2x256xf32>
    %51 = vector.extract_strided_slice %50 {offsets = [0, 0], sizes = [2, 128], strides = [1, 1]} : vector<2x256xf32> to vector<2x128xf32>
    %c2 = arith.constant 2 : index
    %c0_20 = arith.constant 0 : index
    %52 = vector.load %arg0[%c2, %c0_20] : memref<16x128xf32, #tpu.memory_space<vmem>>, vector<2x128xf32>
    %53 = arith.addf %51, %52 : vector<2x128xf32>
    %54 = arith.mulf %53, %15 : vector<2x128xf32>
    %55 = arith.negf %54 : vector<2x128xf32>
    %56 = math.exp %55 : vector<2x128xf32>
    %cst_21 = arith.constant 1.000000e+00 : f32
    %57 = vector.broadcast %cst_21 : f32 to vector<2x128xf32>
    %58 = arith.addf %57, %56 : vector<2x128xf32>
    %59 = arith.divf %57, %58 : vector<2x128xf32>
    %60 = arith.mulf %59, %15 : vector<2x128xf32>
    %61 = arith.subf %60, %18 : vector<2x128xf32>
    %62 = vector.extract_strided_slice %61 {offsets = [0, 0], sizes = [2, 32], strides = [1, 1]} : vector<2x128xf32> to vector<2x32xf32>
    %63 = vector.extract_strided_slice %61 {offsets = [0, 32], sizes = [2, 32], strides = [1, 1]} : vector<2x128xf32> to vector<2x32xf32>
    %64 = vector.extract_strided_slice %61 {offsets = [0, 64], sizes = [2, 32], strides = [1, 1]} : vector<2x128xf32> to vector<2x32xf32>
    %65 = vector.extract_strided_slice %61 {offsets = [0, 96], sizes = [2, 32], strides = [1, 1]} : vector<2x128xf32> to vector<2x32xf32>
    %66 = arith.mulf %63, %44 : vector<2x32xf32>
    %67 = arith.mulf %62, %64 : vector<2x32xf32>
    %68 = arith.addf %66, %67 : vector<2x32xf32>
    %69 = math.tanh %68 : vector<2x32xf32>
    %70 = arith.mulf %65, %69 : vector<2x32xf32>
    %71 = vector.extract_strided_slice %50 {offsets = [0, 128], sizes = [2, 128], strides = [1, 1]} : vector<2x256xf32> to vector<2x128xf32>
    %72 = arith.mulf %71, %15 : vector<2x128xf32>
    %73 = arith.negf %72 : vector<2x128xf32>
    %74 = math.exp %73 : vector<2x128xf32>
    %cst_22 = arith.constant 1.000000e+00 : f32
    %75 = vector.broadcast %cst_22 : f32 to vector<2x128xf32>
    %76 = arith.addf %75, %74 : vector<2x128xf32>
    %77 = arith.divf %75, %76 : vector<2x128xf32>
    %78 = arith.mulf %77, %15 : vector<2x128xf32>
    %79 = arith.subf %78, %18 : vector<2x128xf32>
    %80 = vector.extract_strided_slice %79 {offsets = [0, 0], sizes = [2, 32], strides = [1, 1]} : vector<2x128xf32> to vector<2x32xf32>
    %81 = vector.extract_strided_slice %79 {offsets = [0, 32], sizes = [2, 32], strides = [1, 1]} : vector<2x128xf32> to vector<2x32xf32>
    %82 = vector.extract_strided_slice %79 {offsets = [0, 64], sizes = [2, 32], strides = [1, 1]} : vector<2x128xf32> to vector<2x32xf32>
    %83 = vector.extract_strided_slice %79 {offsets = [0, 96], sizes = [2, 32], strides = [1, 1]} : vector<2x128xf32> to vector<2x32xf32>
    %84 = arith.mulf %81, %22 : vector<2x32xf32>
    %85 = arith.mulf %80, %82 : vector<2x32xf32>
    %86 = arith.addf %84, %85 : vector<2x32xf32>
    %87 = math.tanh %86 : vector<2x32xf32>
    %88 = arith.mulf %83, %87 : vector<2x32xf32>
    %c0_23 = arith.constant 0 : index
    %c0_24 = arith.constant 0 : index
    %89 = vector.load %arg8[%c0_23, %c0_24] : memref<16x32xf32, #tpu.memory_space<vmem>>, vector<2x32xf32>
    tpu.vector_store %arg8[%c0_23, %c0_24], %88 {strides = array<i32>} : memref<16x32xf32, #tpu.memory_space<vmem>>, vector<2x32xf32>,
    %cst_25 = arith.constant dense<0.000000e+00> : vector<2x256xf32>
    %90 = tpu.matmul %70, %1, %cst_25 {dimension_numbers = #tpu.dot_dimension_numbers<[1], [0], [0], [1], [0, 0, 1, 1], [], []>} : vector<2x32xf32>, vector<32x256xf32>, vector<2x256xf32> -> vector<2x256xf32>
    %91 = arith.addf %6, %90 : vector<2x256xf32>
    %cst_26 = arith.constant dense<0.000000e+00> : vector<2x256xf32>
    %92 = tpu.matmul %88, %3, %cst_26 {dimension_numbers = #tpu.dot_dimension_numbers<[1], [0], [0], [1], [0, 0, 1, 1], [], []>} : vector<2x32xf32>, vector<32x256xf32>, vector<2x256xf32> -> vector<2x256xf32>
    %93 = arith.addf %91, %92 : vector<2x256xf32>
    %94 = vector.extract_strided_slice %93 {offsets = [0, 0], sizes = [2, 128], strides = [1, 1]} : vector<2x256xf32> to vector<2x128xf32>
    %c4 = arith.constant 4 : index
    %c0_27 = arith.constant 0 : index
    %95 = vector.load %arg0[%c4, %c0_27] : memref<16x128xf32, #tpu.memory_space<vmem>>, vector<2x128xf32>
    %96 = arith.addf %94, %95 : vector<2x128xf32>
    %97 = arith.mulf %96, %15 : vector<2x128xf32>
    %98 = arith.negf %97 : vector<2x128xf32>
    %99 = math.exp %98 : vector<2x128xf32>
    %cst_28 = arith.constant 1.000000e+00 : f32
    %100 = vector.broadcast %cst_28 : f32 to vector<2x128xf32>
    %101 = arith.addf %100, %99 : vector<2x128xf32>
    %102 = arith.divf %100, %101 : vector<2x128xf32>
    %103 = arith.mulf %102, %15 : vector<2x128xf32>
    %104 = arith.subf %103, %18 : vector<2x128xf32>
    %105 = vector.extract_strided_slice %104 {offsets = [0, 0], sizes = [2, 32], strides = [1, 1]} : vector<2x128xf32> to vector<2x32xf32>
    %106 = vector.extract_strided_slice %104 {offsets = [0, 32], sizes = [2, 32], strides = [1, 1]} : vector<2x128xf32> to vector<2x32xf32>
    %107 = vector.extract_strided_slice %104 {offsets = [0, 64], sizes = [2, 32], strides = [1, 1]} : vector<2x128xf32> to vector<2x32xf32>
    %108 = vector.extract_strided_slice %104 {offsets = [0, 96], sizes = [2, 32], strides = [1, 1]} : vector<2x128xf32> to vector<2x32xf32>
    %109 = arith.mulf %106, %68 : vector<2x32xf32>
    %110 = arith.mulf %105, %107 : vector<2x32xf32>
    %111 = arith.addf %109, %110 : vector<2x32xf32>
    %112 = math.tanh %111 : vector<2x32xf32>
    %113 = arith.mulf %108, %112 : vector<2x32xf32>
    %114 = vector.extract_strided_slice %93 {offsets = [0, 128], sizes = [2, 128], strides = [1, 1]} : vector<2x256xf32> to vector<2x128xf32>
    %115 = arith.mulf %114, %15 : vector<2x128xf32>
    %116 = arith.negf %115 : vector<2x128xf32>
    %117 = math.exp %116 : vector<2x128xf32>
    %cst_29 = arith.constant 1.000000e+00 : f32
    %118 = vector.broadcast %cst_29 : f32 to vector<2x128xf32>
    %119 = arith.addf %118, %117 : vector<2x128xf32>
    %120 = arith.divf %118, %119 : vector<2x128xf32>
    %121 = arith.mulf %120, %15 : vector<2x128xf32>
    %122 = arith.subf %121, %18 : vector<2x128xf32>
    %123 = vector.extract_strided_slice %122 {offsets = [0, 0], sizes = [2, 32], strides = [1, 1]} : vector<2x128xf32> to vector<2x32xf32>
    %124 = vector.extract_strided_slice %122 {offsets = [0, 32], sizes = [2, 32], strides = [1, 1]} : vector<2x128xf32> to vector<2x32xf32>
    %125 = vector.extract_strided_slice %122 {offsets = [0, 64], sizes = [2, 32], strides = [1, 1]} : vector<2x128xf32> to vector<2x32xf32>
    %126 = vector.extract_strided_slice %122 {offsets = [0, 96], sizes = [2, 32], strides = [1, 1]} : vector<2x128xf32> to vector<2x32xf32>
    %127 = arith.mulf %124, %86 : vector<2x32xf32>
    %128 = arith.mulf %123, %125 : vector<2x32xf32>
    %129 = arith.addf %127, %128 : vector<2x32xf32>
    %130 = math.tanh %129 : vector<2x32xf32>
    %131 = arith.mulf %126, %130 : vector<2x32xf32>
    %c2_30 = arith.constant 2 : index
    %c0_31 = arith.constant 0 : index
    %132 = vector.load %arg8[%c2_30, %c0_31] : memref<16x32xf32, #tpu.memory_space<vmem>>, vector<2x32xf32>
    tpu.vector_store %arg8[%c2_30, %c0_31], %131 {strides = array<i32>} : memref<16x32xf32, #tpu.memory_space<vmem>>, vector<2x32xf32>,
    %cst_32 = arith.constant dense<0.000000e+00> : vector<2x256xf32>
    %133 = tpu.matmul %113, %1, %cst_32 {dimension_numbers = #tpu.dot_dimension_numbers<[1], [0], [0], [1], [0, 0, 1, 1], [], []>} : vector<2x32xf32>, vector<32x256xf32>, vector<2x256xf32> -> vector<2x256xf32>
    %134 = arith.addf %6, %133 : vector<2x256xf32>
    %cst_33 = arith.constant dense<0.000000e+00> : vector<2x256xf32>
    %135 = tpu.matmul %131, %3, %cst_33 {dimension_numbers = #tpu.dot_dimension_numbers<[1], [0], [0], [1], [0, 0, 1, 1], [], []>} : vector<2x32xf32>, vector<32x256xf32>, vector<2x256xf32> -> vector<2x256xf32>
    %136 = arith.addf %134, %135 : vector<2x256xf32>
    %137 = vector.extract_strided_slice %136 {offsets = [0, 0], sizes = [2, 128], strides = [1, 1]} : vector<2x256xf32> to vector<2x128xf32>
    %c6 = arith.constant 6 : index
    %c0_34 = arith.constant 0 : index
    %138 = vector.load %arg0[%c6, %c0_34] : memref<16x128xf32, #tpu.memory_space<vmem>>, vector<2x128xf32>
    %139 = arith.addf %137, %138 : vector<2x128xf32>
    %140 = arith.mulf %139, %15 : vector<2x128xf32>
    %141 = arith.negf %140 : vector<2x128xf32>
    %142 = math.exp %141 : vector<2x128xf32>
    %cst_35 = arith.constant 1.000000e+00 : f32
    %143 = vector.broadcast %cst_35 : f32 to vector<2x128xf32>
    %144 = arith.addf %143, %142 : vector<2x128xf32>
    %145 = arith.divf %143, %144 : vector<2x128xf32>
    %146 = arith.mulf %145, %15 : vector<2x128xf32>
    %147 = arith.subf %146, %18 : vector<2x128xf32>
    %148 = vector.extract_strided_slice %147 {offsets = [0, 0], sizes = [2, 32], strides = [1, 1]} : vector<2x128xf32> to vector<2x32xf32>
    %149 = vector.extract_strided_slice %147 {offsets = [0, 32], sizes = [2, 32], strides = [1, 1]} : vector<2x128xf32> to vector<2x32xf32>
    %150 = vector.extract_strided_slice %147 {offsets = [0, 64], sizes = [2, 32], strides = [1, 1]} : vector<2x128xf32> to vector<2x32xf32>
    %151 = vector.extract_strided_slice %147 {offsets = [0, 96], sizes = [2, 32], strides = [1, 1]} : vector<2x128xf32> to vector<2x32xf32>
    %152 = arith.mulf %149, %111 : vector<2x32xf32>
    %153 = arith.mulf %148, %150 : vector<2x32xf32>
    %154 = arith.addf %152, %153 : vector<2x32xf32>
    %155 = math.tanh %154 : vector<2x32xf32>
    %156 = arith.mulf %151, %155 : vector<2x32xf32>
    %157 = vector.extract_strided_slice %136 {offsets = [0, 128], sizes = [2, 128], strides = [1, 1]} : vector<2x256xf32> to vector<2x128xf32>
    %158 = arith.mulf %157, %15 : vector<2x128xf32>
    %159 = arith.negf %158 : vector<2x128xf32>
    %160 = math.exp %159 : vector<2x128xf32>
    %cst_36 = arith.constant 1.000000e+00 : f32
    %161 = vector.broadcast %cst_36 : f32 to vector<2x128xf32>
    %162 = arith.addf %161, %160 : vector<2x128xf32>
    %163 = arith.divf %161, %162 : vector<2x128xf32>
    %164 = arith.mulf %163, %15 : vector<2x128xf32>
    %165 = arith.subf %164, %18 : vector<2x128xf32>
    %166 = vector.extract_strided_slice %165 {offsets = [0, 0], sizes = [2, 32], strides = [1, 1]} : vector<2x128xf32> to vector<2x32xf32>
    %167 = vector.extract_strided_slice %165 {offsets = [0, 32], sizes = [2, 32], strides = [1, 1]} : vector<2x128xf32> to vector<2x32xf32>
    %168 = vector.extract_strided_slice %165 {offsets = [0, 64], sizes = [2, 32], strides = [1, 1]} : vector<2x128xf32> to vector<2x32xf32>
    %169 = vector.extract_strided_slice %165 {offsets = [0, 96], sizes = [2, 32], strides = [1, 1]} : vector<2x128xf32> to vector<2x32xf32>
    %170 = arith.mulf %167, %129 : vector<2x32xf32>
    %171 = arith.mulf %166, %168 : vector<2x32xf32>
    %172 = arith.addf %170, %171 : vector<2x32xf32>
    %173 = math.tanh %172 : vector<2x32xf32>
    %174 = arith.mulf %169, %173 : vector<2x32xf32>
    %c4_37 = arith.constant 4 : index
    %c0_38 = arith.constant 0 : index
    %175 = vector.load %arg8[%c4_37, %c0_38] : memref<16x32xf32, #tpu.memory_space<vmem>>, vector<2x32xf32>
    tpu.vector_store %arg8[%c4_37, %c0_38], %174 {strides = array<i32>} : memref<16x32xf32, #tpu.memory_space<vmem>>, vector<2x32xf32>,
    %cst_39 = arith.constant dense<0.000000e+00> : vector<2x256xf32>
    %176 = tpu.matmul %156, %1, %cst_39 {dimension_numbers = #tpu.dot_dimension_numbers<[1], [0], [0], [1], [0, 0, 1, 1], [], []>} : vector<2x32xf32>, vector<32x256xf32>, vector<2x256xf32> -> vector<2x256xf32>
    %177 = arith.addf %6, %176 : vector<2x256xf32>
    %cst_40 = arith.constant dense<0.000000e+00> : vector<2x256xf32>
    %178 = tpu.matmul %174, %3, %cst_40 {dimension_numbers = #tpu.dot_dimension_numbers<[1], [0], [0], [1], [0, 0, 1, 1], [], []>} : vector<2x32xf32>, vector<32x256xf32>, vector<2x256xf32> -> vector<2x256xf32>
    %179 = arith.addf %177, %178 : vector<2x256xf32>
    %180 = vector.extract_strided_slice %179 {offsets = [0, 0], sizes = [2, 128], strides = [1, 1]} : vector<2x256xf32> to vector<2x128xf32>
    %c8 = arith.constant 8 : index
    %c0_41 = arith.constant 0 : index
    %181 = vector.load %arg0[%c8, %c0_41] : memref<16x128xf32, #tpu.memory_space<vmem>>, vector<2x128xf32>
    %182 = arith.addf %180, %181 : vector<2x128xf32>
    %183 = arith.mulf %182, %15 : vector<2x128xf32>
    %184 = arith.negf %183 : vector<2x128xf32>
    %185 = math.exp %184 : vector<2x128xf32>
    %cst_42 = arith.constant 1.000000e+00 : f32
    %186 = vector.broadcast %cst_42 : f32 to vector<2x128xf32>
    %187 = arith.addf %186, %185 : vector<2x128xf32>
    %188 = arith.divf %186, %187 : vector<2x128xf32>
    %189 = arith.mulf %188, %15 : vector<2x128xf32>
    %190 = arith.subf %189, %18 : vector<2x128xf32>
    %191 = vector.extract_strided_slice %190 {offsets = [0, 0], sizes = [2, 32], strides = [1, 1]} : vector<2x128xf32> to vector<2x32xf32>
    %192 = vector.extract_strided_slice %190 {offsets = [0, 32], sizes = [2, 32], strides = [1, 1]} : vector<2x128xf32> to vector<2x32xf32>
    %193 = vector.extract_strided_slice %190 {offsets = [0, 64], sizes = [2, 32], strides = [1, 1]} : vector<2x128xf32> to vector<2x32xf32>
    %194 = vector.extract_strided_slice %190 {offsets = [0, 96], sizes = [2, 32], strides = [1, 1]} : vector<2x128xf32> to vector<2x32xf32>
    %195 = arith.mulf %192, %154 : vector<2x32xf32>
    %196 = arith.mulf %191, %193 : vector<2x32xf32>
    %197 = arith.addf %195, %196 : vector<2x32xf32>
    %198 = math.tanh %197 : vector<2x32xf32>
    %199 = arith.mulf %194, %198 : vector<2x32xf32>
    %200 = vector.extract_strided_slice %179 {offsets = [0, 128], sizes = [2, 128], strides = [1, 1]} : vector<2x256xf32> to vector<2x128xf32>
    %201 = arith.mulf %200, %15 : vector<2x128xf32>
    %202 = arith.negf %201 : vector<2x128xf32>
    %203 = math.exp %202 : vector<2x128xf32>
    %cst_43 = arith.constant 1.000000e+00 : f32
    %204 = vector.broadcast %cst_43 : f32 to vector<2x128xf32>
    %205 = arith.addf %204, %203 : vector<2x128xf32>
    %206 = arith.divf %204, %205 : vector<2x128xf32>
    %207 = arith.mulf %206, %15 : vector<2x128xf32>
    %208 = arith.subf %207, %18 : vector<2x128xf32>
    %209 = vector.extract_strided_slice %208 {offsets = [0, 0], sizes = [2, 32], strides = [1, 1]} : vector<2x128xf32> to vector<2x32xf32>
    %210 = vector.extract_strided_slice %208 {offsets = [0, 32], sizes = [2, 32], strides = [1, 1]} : vector<2x128xf32> to vector<2x32xf32>
    %211 = vector.extract_strided_slice %208 {offsets = [0, 64], sizes = [2, 32], strides = [1, 1]} : vector<2x128xf32> to vector<2x32xf32>
    %212 = vector.extract_strided_slice %208 {offsets = [0, 96], sizes = [2, 32], strides = [1, 1]} : vector<2x128xf32> to vector<2x32xf32>
    %213 = arith.mulf %210, %172 : vector<2x32xf32>
    %214 = arith.mulf %209, %211 : vector<2x32xf32>
    %215 = arith.addf %213, %214 : vector<2x32xf32>
    %216 = math.tanh %215 : vector<2x32xf32>
    %217 = arith.mulf %212, %216 : vector<2x32xf32>
    %c6_44 = arith.constant 6 : index
    %c0_45 = arith.constant 0 : index
    %218 = vector.load %arg8[%c6_44, %c0_45] : memref<16x32xf32, #tpu.memory_space<vmem>>, vector<2x32xf32>
    tpu.vector_store %arg8[%c6_44, %c0_45], %217 {strides = array<i32>} : memref<16x32xf32, #tpu.memory_space<vmem>>, vector<2x32xf32>,
    %cst_46 = arith.constant dense<0.000000e+00> : vector<2x256xf32>
    %219 = tpu.matmul %199, %1, %cst_46 {dimension_numbers = #tpu.dot_dimension_numbers<[1], [0], [0], [1], [0, 0, 1, 1], [], []>} : vector<2x32xf32>, vector<32x256xf32>, vector<2x256xf32> -> vector<2x256xf32>
    %220 = arith.addf %6, %219 : vector<2x256xf32>
    %cst_47 = arith.constant dense<0.000000e+00> : vector<2x256xf32>
    %221 = tpu.matmul %217, %3, %cst_47 {dimension_numbers = #tpu.dot_dimension_numbers<[1], [0], [0], [1], [0, 0, 1, 1], [], []>} : vector<2x32xf32>, vector<32x256xf32>, vector<2x256xf32> -> vector<2x256xf32>
    %222 = arith.addf %220, %221 : vector<2x256xf32>
    %223 = vector.extract_strided_slice %222 {offsets = [0, 0], sizes = [2, 128], strides = [1, 1]} : vector<2x256xf32> to vector<2x128xf32>
    %c10 = arith.constant 10 : index
    %c0_48 = arith.constant 0 : index
    %224 = vector.load %arg0[%c10, %c0_48] : memref<16x128xf32, #tpu.memory_space<vmem>>, vector<2x128xf32>
    %225 = arith.addf %223, %224 : vector<2x128xf32>
    %226 = arith.mulf %225, %15 : vector<2x128xf32>
    %227 = arith.negf %226 : vector<2x128xf32>
    %228 = math.exp %227 : vector<2x128xf32>
    %cst_49 = arith.constant 1.000000e+00 : f32
    %229 = vector.broadcast %cst_49 : f32 to vector<2x128xf32>
    %230 = arith.addf %229, %228 : vector<2x128xf32>
    %231 = arith.divf %229, %230 : vector<2x128xf32>
    %232 = arith.mulf %231, %15 : vector<2x128xf32>
    %233 = arith.subf %232, %18 : vector<2x128xf32>
    %234 = vector.extract_strided_slice %233 {offsets = [0, 0], sizes = [2, 32], strides = [1, 1]} : vector<2x128xf32> to vector<2x32xf32>
    %235 = vector.extract_strided_slice %233 {offsets = [0, 32], sizes = [2, 32], strides = [1, 1]} : vector<2x128xf32> to vector<2x32xf32>
    %236 = vector.extract_strided_slice %233 {offsets = [0, 64], sizes = [2, 32], strides = [1, 1]} : vector<2x128xf32> to vector<2x32xf32>
    %237 = vector.extract_strided_slice %233 {offsets = [0, 96], sizes = [2, 32], strides = [1, 1]} : vector<2x128xf32> to vector<2x32xf32>
    %238 = arith.mulf %235, %197 : vector<2x32xf32>
    %239 = arith.mulf %234, %236 : vector<2x32xf32>
    %240 = arith.addf %238, %239 : vector<2x32xf32>
    %241 = math.tanh %240 : vector<2x32xf32>
    %242 = arith.mulf %237, %241 : vector<2x32xf32>
    %243 = vector.extract_strided_slice %222 {offsets = [0, 128], sizes = [2, 128], strides = [1, 1]} : vector<2x256xf32> to vector<2x128xf32>
    %244 = arith.mulf %243, %15 : vector<2x128xf32>
    %245 = arith.negf %244 : vector<2x128xf32>
    %246 = math.exp %245 : vector<2x128xf32>
    %cst_50 = arith.constant 1.000000e+00 : f32
    %247 = vector.broadcast %cst_50 : f32 to vector<2x128xf32>
    %248 = arith.addf %247, %246 : vector<2x128xf32>
    %249 = arith.divf %247, %248 : vector<2x128xf32>
    %250 = arith.mulf %249, %15 : vector<2x128xf32>
    %251 = arith.subf %250, %18 : vector<2x128xf32>
    %252 = vector.extract_strided_slice %251 {offsets = [0, 0], sizes = [2, 32], strides = [1, 1]} : vector<2x128xf32> to vector<2x32xf32>
    %253 = vector.extract_strided_slice %251 {offsets = [0, 32], sizes = [2, 32], strides = [1, 1]} : vector<2x128xf32> to vector<2x32xf32>
    %254 = vector.extract_strided_slice %251 {offsets = [0, 64], sizes = [2, 32], strides = [1, 1]} : vector<2x128xf32> to vector<2x32xf32>
    %255 = vector.extract_strided_slice %251 {offsets = [0, 96], sizes = [2, 32], strides = [1, 1]} : vector<2x128xf32> to vector<2x32xf32>
    %256 = arith.mulf %253, %215 : vector<2x32xf32>
    %257 = arith.mulf %252, %254 : vector<2x32xf32>
    %258 = arith.addf %256, %257 : vector<2x32xf32>
    %259 = math.tanh %258 : vector<2x32xf32>
    %260 = arith.mulf %255, %259 : vector<2x32xf32>
    %c8_51 = arith.constant 8 : index
    %c0_52 = arith.constant 0 : index
    %261 = vector.load %arg8[%c8_51, %c0_52] : memref<16x32xf32, #tpu.memory_space<vmem>>, vector<2x32xf32>
    tpu.vector_store %arg8[%c8_51, %c0_52], %260 {strides = array<i32>} : memref<16x32xf32, #tpu.memory_space<vmem>>, vector<2x32xf32>,
    %cst_53 = arith.constant dense<0.000000e+00> : vector<2x256xf32>
    %262 = tpu.matmul %242, %1, %cst_53 {dimension_numbers = #tpu.dot_dimension_numbers<[1], [0], [0], [1], [0, 0, 1, 1], [], []>} : vector<2x32xf32>, vector<32x256xf32>, vector<2x256xf32> -> vector<2x256xf32>
    %263 = arith.addf %6, %262 : vector<2x256xf32>
    %cst_54 = arith.constant dense<0.000000e+00> : vector<2x256xf32>
    %264 = tpu.matmul %260, %3, %cst_54 {dimension_numbers = #tpu.dot_dimension_numbers<[1], [0], [0], [1], [0, 0, 1, 1], [], []>} : vector<2x32xf32>, vector<32x256xf32>, vector<2x256xf32> -> vector<2x256xf32>
    %265 = arith.addf %263, %264 : vector<2x256xf32>
    %266 = vector.extract_strided_slice %265 {offsets = [0, 0], sizes = [2, 128], strides = [1, 1]} : vector<2x256xf32> to vector<2x128xf32>
    %c12 = arith.constant 12 : index
    %c0_55 = arith.constant 0 : index
    %267 = vector.load %arg0[%c12, %c0_55] : memref<16x128xf32, #tpu.memory_space<vmem>>, vector<2x128xf32>
    %268 = arith.addf %266, %267 : vector<2x128xf32>
    %269 = arith.mulf %268, %15 : vector<2x128xf32>
    %270 = arith.negf %269 : vector<2x128xf32>
    %271 = math.exp %270 : vector<2x128xf32>
    %cst_56 = arith.constant 1.000000e+00 : f32
    %272 = vector.broadcast %cst_56 : f32 to vector<2x128xf32>
    %273 = arith.addf %272, %271 : vector<2x128xf32>
    %274 = arith.divf %272, %273 : vector<2x128xf32>
    %275 = arith.mulf %274, %15 : vector<2x128xf32>
    %276 = arith.subf %275, %18 : vector<2x128xf32>
    %277 = vector.extract_strided_slice %276 {offsets = [0, 0], sizes = [2, 32], strides = [1, 1]} : vector<2x128xf32> to vector<2x32xf32>
    %278 = vector.extract_strided_slice %276 {offsets = [0, 32], sizes = [2, 32], strides = [1, 1]} : vector<2x128xf32> to vector<2x32xf32>
    %279 = vector.extract_strided_slice %276 {offsets = [0, 64], sizes = [2, 32], strides = [1, 1]} : vector<2x128xf32> to vector<2x32xf32>
    %280 = vector.extract_strided_slice %276 {offsets = [0, 96], sizes = [2, 32], strides = [1, 1]} : vector<2x128xf32> to vector<2x32xf32>
    %281 = arith.mulf %278, %240 : vector<2x32xf32>
    %282 = arith.mulf %277, %279 : vector<2x32xf32>
    %283 = arith.addf %281, %282 : vector<2x32xf32>
    %284 = math.tanh %283 : vector<2x32xf32>
    %285 = arith.mulf %280, %284 : vector<2x32xf32>
    %286 = vector.extract_strided_slice %265 {offsets = [0, 128], sizes = [2, 128], strides = [1, 1]} : vector<2x256xf32> to vector<2x128xf32>
    %287 = arith.mulf %286, %15 : vector<2x128xf32>
    %288 = arith.negf %287 : vector<2x128xf32>
    %289 = math.exp %288 : vector<2x128xf32>
    %cst_57 = arith.constant 1.000000e+00 : f32
    %290 = vector.broadcast %cst_57 : f32 to vector<2x128xf32>
    %291 = arith.addf %290, %289 : vector<2x128xf32>
    %292 = arith.divf %290, %291 : vector<2x128xf32>
    %293 = arith.mulf %292, %15 : vector<2x128xf32>
    %294 = arith.subf %293, %18 : vector<2x128xf32>
    %295 = vector.extract_strided_slice %294 {offsets = [0, 0], sizes = [2, 32], strides = [1, 1]} : vector<2x128xf32> to vector<2x32xf32>
    %296 = vector.extract_strided_slice %294 {offsets = [0, 32], sizes = [2, 32], strides = [1, 1]} : vector<2x128xf32> to vector<2x32xf32>
    %297 = vector.extract_strided_slice %294 {offsets = [0, 64], sizes = [2, 32], strides = [1, 1]} : vector<2x128xf32> to vector<2x32xf32>
    %298 = vector.extract_strided_slice %294 {offsets = [0, 96], sizes = [2, 32], strides = [1, 1]} : vector<2x128xf32> to vector<2x32xf32>
    %299 = arith.mulf %296, %258 : vector<2x32xf32>
    %300 = arith.mulf %295, %297 : vector<2x32xf32>
    %301 = arith.addf %299, %300 : vector<2x32xf32>
    %302 = math.tanh %301 : vector<2x32xf32>
    %303 = arith.mulf %298, %302 : vector<2x32xf32>
    %c10_58 = arith.constant 10 : index
    %c0_59 = arith.constant 0 : index
    %304 = vector.load %arg8[%c10_58, %c0_59] : memref<16x32xf32, #tpu.memory_space<vmem>>, vector<2x32xf32>
    tpu.vector_store %arg8[%c10_58, %c0_59], %303 {strides = array<i32>} : memref<16x32xf32, #tpu.memory_space<vmem>>, vector<2x32xf32>,
    %cst_60 = arith.constant dense<0.000000e+00> : vector<2x256xf32>
    %305 = tpu.matmul %285, %1, %cst_60 {dimension_numbers = #tpu.dot_dimension_numbers<[1], [0], [0], [1], [0, 0, 1, 1], [], []>} : vector<2x32xf32>, vector<32x256xf32>, vector<2x256xf32> -> vector<2x256xf32>
    %306 = arith.addf %6, %305 : vector<2x256xf32>
    %cst_61 = arith.constant dense<0.000000e+00> : vector<2x256xf32>
    %307 = tpu.matmul %303, %3, %cst_61 {dimension_numbers = #tpu.dot_dimension_numbers<[1], [0], [0], [1], [0, 0, 1, 1], [], []>} : vector<2x32xf32>, vector<32x256xf32>, vector<2x256xf32> -> vector<2x256xf32>
    %308 = arith.addf %306, %307 : vector<2x256xf32>
    %309 = vector.extract_strided_slice %308 {offsets = [0, 0], sizes = [2, 128], strides = [1, 1]} : vector<2x256xf32> to vector<2x128xf32>
    %c14 = arith.constant 14 : index
    %c0_62 = arith.constant 0 : index
    %310 = vector.load %arg0[%c14, %c0_62] : memref<16x128xf32, #tpu.memory_space<vmem>>, vector<2x128xf32>
    %311 = arith.addf %309, %310 : vector<2x128xf32>
    %312 = arith.mulf %311, %15 : vector<2x128xf32>
    %313 = arith.negf %312 : vector<2x128xf32>
    %314 = math.exp %313 : vector<2x128xf32>
    %cst_63 = arith.constant 1.000000e+00 : f32
    %315 = vector.broadcast %cst_63 : f32 to vector<2x128xf32>
    %316 = arith.addf %315, %314 : vector<2x128xf32>
    %317 = arith.divf %315, %316 : vector<2x128xf32>
    %318 = arith.mulf %317, %15 : vector<2x128xf32>
    %319 = arith.subf %318, %18 : vector<2x128xf32>
    %320 = vector.extract_strided_slice %319 {offsets = [0, 0], sizes = [2, 32], strides = [1, 1]} : vector<2x128xf32> to vector<2x32xf32>
    %321 = vector.extract_strided_slice %319 {offsets = [0, 32], sizes = [2, 32], strides = [1, 1]} : vector<2x128xf32> to vector<2x32xf32>
    %322 = vector.extract_strided_slice %319 {offsets = [0, 64], sizes = [2, 32], strides = [1, 1]} : vector<2x128xf32> to vector<2x32xf32>
    %323 = vector.extract_strided_slice %319 {offsets = [0, 96], sizes = [2, 32], strides = [1, 1]} : vector<2x128xf32> to vector<2x32xf32>
    %324 = arith.mulf %321, %283 : vector<2x32xf32>
    %325 = arith.mulf %320, %322 : vector<2x32xf32>
    %326 = arith.addf %324, %325 : vector<2x32xf32>
    %327 = math.tanh %326 : vector<2x32xf32>
    %328 = arith.mulf %323, %327 : vector<2x32xf32>
    %329 = vector.extract_strided_slice %308 {offsets = [0, 128], sizes = [2, 128], strides = [1, 1]} : vector<2x256xf32> to vector<2x128xf32>
    %330 = arith.mulf %329, %15 : vector<2x128xf32>
    %331 = arith.negf %330 : vector<2x128xf32>
    %332 = math.exp %331 : vector<2x128xf32>
    %cst_64 = arith.constant 1.000000e+00 : f32
    %333 = vector.broadcast %cst_64 : f32 to vector<2x128xf32>
    %334 = arith.addf %333, %332 : vector<2x128xf32>
    %335 = arith.divf %333, %334 : vector<2x128xf32>
    %336 = arith.mulf %335, %15 : vector<2x128xf32>
    %337 = arith.subf %336, %18 : vector<2x128xf32>
    %338 = vector.extract_strided_slice %337 {offsets = [0, 0], sizes = [2, 32], strides = [1, 1]} : vector<2x128xf32> to vector<2x32xf32>
    %339 = vector.extract_strided_slice %337 {offsets = [0, 32], sizes = [2, 32], strides = [1, 1]} : vector<2x128xf32> to vector<2x32xf32>
    %340 = vector.extract_strided_slice %337 {offsets = [0, 64], sizes = [2, 32], strides = [1, 1]} : vector<2x128xf32> to vector<2x32xf32>
    %341 = vector.extract_strided_slice %337 {offsets = [0, 96], sizes = [2, 32], strides = [1, 1]} : vector<2x128xf32> to vector<2x32xf32>
    %342 = arith.mulf %339, %301 : vector<2x32xf32>
    %343 = arith.mulf %338, %340 : vector<2x32xf32>
    %344 = arith.addf %342, %343 : vector<2x32xf32>
    %345 = math.tanh %344 : vector<2x32xf32>
    %346 = arith.mulf %341, %345 : vector<2x32xf32>
    %c12_65 = arith.constant 12 : index
    %c0_66 = arith.constant 0 : index
    %347 = vector.load %arg8[%c12_65, %c0_66] : memref<16x32xf32, #tpu.memory_space<vmem>>, vector<2x32xf32>
    tpu.vector_store %arg8[%c12_65, %c0_66], %346 {strides = array<i32>} : memref<16x32xf32, #tpu.memory_space<vmem>>, vector<2x32xf32>,
    %cst_67 = arith.constant dense<0.000000e+00> : vector<2x256xf32>
    %348 = tpu.matmul %328, %1, %cst_67 {dimension_numbers = #tpu.dot_dimension_numbers<[1], [0], [0], [1], [0, 0, 1, 1], [], []>} : vector<2x32xf32>, vector<32x256xf32>, vector<2x256xf32> -> vector<2x256xf32>
    %349 = arith.addf %6, %348 : vector<2x256xf32>
    %cst_68 = arith.constant dense<0.000000e+00> : vector<2x256xf32>
    %350 = tpu.matmul %346, %3, %cst_68 {dimension_numbers = #tpu.dot_dimension_numbers<[1], [0], [0], [1], [0, 0, 1, 1], [], []>} : vector<2x32xf32>, vector<32x256xf32>, vector<2x256xf32> -> vector<2x256xf32>
    %351 = arith.addf %349, %350 : vector<2x256xf32>
    %352 = vector.extract_strided_slice %351 {offsets = [0, 128], sizes = [2, 128], strides = [1, 1]} : vector<2x256xf32> to vector<2x128xf32>
    %353 = arith.mulf %352, %15 : vector<2x128xf32>
    %354 = arith.negf %353 : vector<2x128xf32>
    %355 = math.exp %354 : vector<2x128xf32>
    %cst_69 = arith.constant 1.000000e+00 : f32
    %356 = vector.broadcast %cst_69 : f32 to vector<2x128xf32>
    %357 = arith.addf %356, %355 : vector<2x128xf32>
    %358 = arith.divf %356, %357 : vector<2x128xf32>
    %359 = arith.mulf %358, %15 : vector<2x128xf32>
    %360 = arith.subf %359, %18 : vector<2x128xf32>
    %361 = vector.extract_strided_slice %360 {offsets = [0, 0], sizes = [2, 32], strides = [1, 1]} : vector<2x128xf32> to vector<2x32xf32>
    %362 = vector.extract_strided_slice %360 {offsets = [0, 32], sizes = [2, 32], strides = [1, 1]} : vector<2x128xf32> to vector<2x32xf32>
    %363 = vector.extract_strided_slice %360 {offsets = [0, 64], sizes = [2, 32], strides = [1, 1]} : vector<2x128xf32> to vector<2x32xf32>
    %364 = vector.extract_strided_slice %360 {offsets = [0, 96], sizes = [2, 32], strides = [1, 1]} : vector<2x128xf32> to vector<2x32xf32>
    %365 = arith.mulf %362, %344 : vector<2x32xf32>
    %366 = arith.mulf %361, %363 : vector<2x32xf32>
    %367 = arith.addf %365, %366 : vector<2x32xf32>
    %368 = math.tanh %367 : vector<2x32xf32>
    %369 = arith.mulf %364, %368 : vector<2x32xf32>
    %c14_70 = arith.constant 14 : index
    %c0_71 = arith.constant 0 : index
    %370 = vector.load %arg8[%c14_70, %c0_71] : memref<16x32xf32, #tpu.memory_space<vmem>>, vector<2x32xf32>
    tpu.vector_store %arg8[%c14_70, %c0_71], %369 {strides = array<i32>} : memref<16x32xf32, #tpu.memory_space<vmem>>, vector<2x32xf32>,
    %c0_72 = arith.constant 0 : index
    %c0_73 = arith.constant 0 : index
    %371 = vector.load %arg8[%c0_72, %c0_73] : memref<16x32xf32, #tpu.memory_space<vmem>>, vector<16x32xf32>
    %c0_74 = arith.constant 0 : index
    %c0_75 = arith.constant 0 : index
    %372 = vector.load %arg3[%c0_74, %c0_75] : memref<32x16xf32, #tpu.memory_space<vmem>>, vector<32x16xf32>
    %cst_76 = arith.constant dense<0.000000e+00> : vector<16x16xf32>
    %373 = tpu.matmul %371, %372, %cst_76 {dimension_numbers = #tpu.dot_dimension_numbers<[1], [0], [0], [1], [0, 0, 1, 1], [], []>} : vector<16x32xf32>, vector<32x16xf32>, vector<16x16xf32> -> vector<16x16xf32>
    %c0_77 = arith.constant 0 : index
    %c0_78 = arith.constant 0 : index
    %374 = vector.load %arg4[%c0_77, %c0_78] : memref<1x16xf32, #tpu.memory_space<vmem>>, vector<1x16xf32>
    %375 = vector.broadcast %374 : vector<1x16xf32> to vector<16x16xf32>
    %376 = arith.addf %373, %375 : vector<16x16xf32>
    %c0_79 = arith.constant 0 : index
    %c0_80 = arith.constant 0 : index
    %377 = vector.load %arg5[%c0_79, %c0_80] : memref<16x16xf32, #tpu.memory_space<vmem>>, vector<16x16xf32>
    tpu.vector_store %arg5[%c0_79, %c0_80], %376 {strides = array<i32>} : memref<16x16xf32, #tpu.memory_space<vmem>>, vector<16x16xf32>,
    %c0_81 = arith.constant 0 : index
    %c0_82 = arith.constant 0 : index
    %c0_83 = arith.constant 0 : index
    %378 = vector.load %arg6[%c0_81, %c0_82, %c0_83] : memref<2x2x32xf32, #tpu.memory_space<vmem>>, vector<1x2x32xf32>
    %379 = vector.shape_cast %378 : vector<1x2x32xf32> to vector<2x32xf32>
    %380 = vector.shape_cast %328 : vector<2x32xf32> to vector<1x2x32xf32>
    tpu.vector_store %arg6[%c0_81, %c0_82, %c0_83], %380 {strides = array<i32>} : memref<2x2x32xf32, #tpu.memory_space<vmem>>, vector<1x2x32xf32>,
    %c0_84 = arith.constant 0 : index
    %c0_85 = arith.constant 0 : index
    %c0_86 = arith.constant 0 : index
    %381 = vector.load %arg7[%c0_84, %c0_85, %c0_86] : memref<2x2x32xf32, #tpu.memory_space<vmem>>, vector<1x2x32xf32>
    %382 = vector.shape_cast %381 : vector<1x2x32xf32> to vector<2x32xf32>
    %383 = vector.shape_cast %326 : vector<2x32xf32> to vector<1x2x32xf32>
    tpu.vector_store %arg7[%c0_84, %c0_85, %c0_86], %383 {strides = array<i32>} : memref<2x2x32xf32, #tpu.memory_space<vmem>>, vector<1x2x32xf32>,
    %c1_87 = arith.constant 1 : index
    %c0_88 = arith.constant 0 : index
    %c0_89 = arith.constant 0 : index
    %384 = vector.load %arg6[%c1_87, %c0_88, %c0_89] : memref<2x2x32xf32, #tpu.memory_space<vmem>>, vector<1x2x32xf32>
    %385 = vector.shape_cast %384 : vector<1x2x32xf32> to vector<2x32xf32>
    %386 = vector.shape_cast %369 : vector<2x32xf32> to vector<1x2x32xf32>
    tpu.vector_store %arg6[%c1_87, %c0_88, %c0_89], %386 {strides = array<i32>} : memref<2x2x32xf32, #tpu.memory_space<vmem>>, vector<1x2x32xf32>,
    %c1_90 = arith.constant 1 : index
    %c0_91 = arith.constant 0 : index
    %c0_92 = arith.constant 0 : index
    %387 = vector.load %arg7[%c1_90, %c0_91, %c0_92] : memref<2x2x32xf32, #tpu.memory_space<vmem>>, vector<1x2x32xf32>
    %388 = vector.shape_cast %387 : vector<1x2x32xf32> to vector<2x32xf32>
    %389 = vector.shape_cast %367 : vector<2x32xf32> to vector<1x2x32xf32>
    tpu.vector_store %arg7[%c1_90, %c0_91, %c0_92], %389 {strides = array<i32>} : memref<2x2x32xf32, #tpu.memory_space<vmem>>, vector<1x2x32xf32>,
    return
  }
}

</mosaic_0001>

<bundles_post_ra>
// kernel: tpu_custom_call.1
= control target key start
LH: loop header
LB: loop body
LE: loop exit
PB: predicated region body
PF: predicated region fallthrough
CT: control target
= control target key end

     0   :  { %13 = vsyncpa [#allocation4], 0  ;;  %s2770_s0 = inlined_call_operand.vmem [shape: f32[16,128], index: 0, kind: input, shape index: {}]   ;;  %s2771_s1 = inlined_call_operand.hbm [shape: f32[2,32,256], index: 1, kind: input, shape index: {}]   ;;  %s2772_s2 = inlined_call_operand.vmem [shape: f32[1,256], index: 2, kind: input, shape index: {}]   ;;  %s2773_s3 = inlined_call_operand.vmem [shape: f32[32,16], index: 3, kind: input, shape index: {}]   ;;  %s2774_s4 = inlined_call_operand.vmem [shape: f32[1,16], index: 4, kind: input, shape index: {}]   ;;  %s2775_s5 = inlined_call_operand.hbm [shape: f32[16,16], index: 5, kind: output, shape index: {0}]   ;;  %s2776_s6 = inlined_call_operand.hbm [shape: f32[2,2,32], index: 6, kind: output, shape index: {1}]   ;;  %s2777_s7 = inlined_call_operand.hbm [shape: f32[2,2,32], index: 7, kind: output, shape index: {2}]  }
   0x1   :  { %14 = vsyncpa [#allocation5], 0 }
   0x2   :  { %15 = vsyncpa [#allocation8], 0  ;;  %s2263_s24 = smov [#allocation3]  }
   0x3   :  { %s23_s25 = sshll.u32 %s2263_s24, 4  ;;  %s24_s25 = int_to_ptr.vmem [resolvable:$true] %s23_s25 }
   0x4   :  { %s2185_s26 = scalar_lea.vmem %s24_s25, 2048  ;;  %p2190_p1 = scmp.lt.s32.totalorder %s24_s25, %s24_s25 }
   0x5   :  { %p2186_p0 = scmp.ne.s32.totalorder %s24_s25, %s2185_s26  ;;  %p2191_p2 = scmp.lt.s32.totalorder %s2185_s26, %s2185_s26 }
   0x7   :  { %p2192_p3 = por %p2191_p2, %p2190_p1 }
   0x9   :  { %p2193_p4 = pnand %p2192_p3, %p2186_p0 }
   0xb   :  { %2196 = shalt.err (!%p2193_p4)
}
   0xc   :  { %s2264_s27 = smov 256   ;;  %s2265_s28 = smov 16  }
   0xd   :  { %29 = dma.hbm_to_vmem [thread:$0]  %s2771_s1, 2048, %s24_s25, [#allocation4], %s2264_s27, %s2264_s27, %s2265_s28  }
   0xe   :  { %2257 = dma.done.wait [#allocation4], 2048  }
   0xf   :  { %2258 = vsyncadd [#allocation4], 4294965248  ;;  %v2266_v0 = vmov 0.0   ;;  %v2322_v1 = vld [vmem:[#allocation3 + $0x38] sm:$0xff]  ;;  %v2326_v3 = vld [vmem:[#allocation3 + $0x30] sm:$0xff]  ;;  %v58_v17 = vlaneseq  ;;  %v2267_v30 = vmov 1.0  }
  0x10   :  { %143 = vmatprep.mubr.f32.mxu0 %v2266_v0  ;;  %214 = vmatprep.mubr.f32.mxu1 %v2266_v0  ;;  %v2324_v2 = vld [vmem:[#allocation3 + $0x78] sm:$0xff]  ;;  %v2330_v4 = vld [vmem:[#allocation3 + $0x70] sm:$0xff]  ;;  %v2332_v5 = vld [vmem:[#allocation3 + $0x28] sm:$0xff]  ;;  %s2269_s11 = smov 32   ;;  %vm75_vm3 = vcmask 261120   ;;  %vm388_vm4 = vcmask 254976  }
  0x11   :  { %103 = vmatprep.subr.mxu0 %v2322_v1  ;;  %174 = vmatprep.subr.mxu1 %v2324_v2  ;;  %v2334_v6 = vld [vmem:[#allocation3 + $0x68] sm:$0xff]  ;;  %v2338_v7 = vld [vmem:[#allocation3 + $0x20] sm:$0xff]  ;;  %v2342_v9 = vld [vmem:[#allocation3 + $0x18] sm:$0xff]  ;;  %v59_v18 = vshrl.u32 %v58_v17, 7  ;;  %v69_v21 = vand.u32 127, %v58_v17 }
  0x12   :  { %104 = vmatpush1.msra.mxu0 %v2326_v3  ;;  %175 = vmatpush1.msra.mxu1 %v2330_v4  ;;  %v2340_v8 = vld [vmem:[#allocation3 + $0x60] sm:$0xff]  ;;  %v2346_v10 = vld [vmem:[#allocation3 + $0x58] sm:$0xff]  ;;  %v2348_v11 = vld [vmem:[#allocation3 + $0x10] sm:$0xff] }
  0x13   :  { %105 = vmatprep.subr.mxu0 %v2332_v5  ;;  %176 = vmatprep.subr.mxu1 %v2334_v6  ;;  %v2350_v12 = vld [vmem:[#allocation3 + $0x50] sm:$0xff]  ;;  %v2354_v13 = vld [vmem:[#allocation3 + $0x8] sm:$0xff]  ;;  %v2360_v15 = vld [vmem:[#allocation3] sm:$0xff]  ;;  %v60_v19 = vsub.s32 0, %v59_v18  ;;  %vm70_vm0 = vcmp.ge.s32.totalorder %v69_v21, 64  ;;  %vm71_vm1 = vcmp.lt.s32.totalorder %v69_v21, 96 }
  0x14   :  { %106 = vmatpush1.msra.mxu0 %v2338_v7  ;;  %177 = vmatpush1.msra.mxu1 %v2340_v8  ;;  %v2356_v14 = vld [vmem:[#allocation3 + $0x48] sm:$0xff]  ;;  %v2362_v16 = vld [vmem:[#allocation3 + $0x40] sm:$0xff]  ;;  %v56_v20 = vld [vmem:[%s2772_s2] sm:$0x3]  ;;  %s2268_s2 = smov 64   ;;  %v64_v50 = vsub.s32 1, %v59_v18 }
  0x15   :  { %107 = vmatprep.subr.mxu0 %v2342_v9  ;;  %178 = vmatprep.subr.mxu1 %v2346_v10  ;;  %v2395_v22 = vrot.slane %v56_v20, %v60_v19  ;;  %vm2397_vm2 = vmand %vm70_vm0, %vm71_vm1  ;;  %v222_v27 = vld [vmem:[%s2770_s0] sm:$0x3]  ;;  %v330_v54 = vld [vmem:[%s2770_s0 + $0x2] sm:$0x3] }
  0x16   :  { %108 = vmatpush1.msra.mxu0 %v2348_v11  ;;  %179 = vmatpush1.msra.mxu1 %v2350_v12  ;;  %v2407_v31 = vsel %vm2397_vm2, 2.0, %v2267_v30  ;;  %v2413_v38 = vsel %vm2397_vm2, 1.0, %v2266_v0  ;;  %v2431_v51 = vrot.slane %v56_v20, %v64_v50 }
  0x17   :  { %109 = vmatprep.subr.mxu0 %v2354_v13  ;;  %180 = vmatprep.subr.mxu1 %v2356_v14 }
  0x18   :  { %110 = vmatpush1.msra.mxu0 %v2360_v15  ;;  %181 = vmatpush1.msra.mxu1 %v2362_v16 }
  0x19   :  { %144 = vmatmul.mubr.f32.vlgmr.msra.gmra.mxu0 %v2266_v0  ;;  %215 = vmatmul.mubr.f32.vlgmr.msra.gmra.mxu1 %v2266_v0 }
  0x1a   :  { %279 = vmatprep.subr.mxu0 %v2322_v1  ;;  %319 = vmatprep.mubr.f32.mxu0 %v2266_v0 }
  0x1b   :  { %280 = vmatpush1.msra.mxu0 %v2326_v3  ;;  %419 = vmatprep.subr.mxu1 %v2322_v1 }
  0x1c   :  { %281 = vmatprep.subr.mxu0 %v2332_v5  ;;  %420 = vmatpush1.msra.mxu1 %v2326_v3 }
  0x1d   :  { %282 = vmatpush1.msra.mxu0 %v2338_v7  ;;  %421 = vmatprep.subr.mxu1 %v2332_v5 }
  0x1e   :  { %283 = vmatprep.subr.mxu0 %v2342_v9  ;;  %422 = vmatpush1.msra.mxu1 %v2338_v7 }
  0x1f   :  { %284 = vmatpush1.msra.mxu0 %v2348_v11  ;;  %423 = vmatprep.subr.mxu1 %v2342_v9 }
  0x20   :  { %285 = vmatprep.subr.mxu0 %v2354_v13  ;;  %424 = vmatpush1.msra.mxu1 %v2348_v11 }
  0x21   :  { %286 = vmatpush1.msra.mxu0 %v2360_v15  ;;  %425 = vmatprep.subr.mxu1 %v2354_v13 }
  0x22   :  { %494 = vmatprep.subr.mxu0 %v2324_v2  ;;  %426 = vmatpush1.msra.mxu1 %v2360_v15 }
  0x23   :  { %459 = vmatprep.mubr.f32.mxu1 %v2266_v0  ;;  %631 = vmatprep.subr.mxu1 %v2322_v1 }
  0xd9   :  { %v145_v23 = vpop.f32.mrf.mxu0  ;;  %v216_v26 = vpop.f32.mrf.mxu1 }
  0xda   :  { %v149_v25 = vadd.f32 %v145_v23, %v2395_v22 }
  0xdb   :  { %v147_v28 = vpop.f32.mrf.mxu0  ;;  %v218_v58 = vpop.f32.mrf.mxu1 }
  0xdc   :  { %v221_v29 = vadd.f32 %v216_v26, %v149_v25 }
  0xde   :  { %v223_v32 = vadd.f32 %v222_v27, %v221_v29 }
  0xe0   :  { %v224_v33 = vmul.f32 %v223_v32, %v2407_v31 }
  0xe2   :  { %v2002_v34 = vmul.f32 -1.442695, %v224_v33 }
  0xe4   :  { %2067 = vpow2.f32 %v2002_v34 }
  0xf1   :  { %v2068_v35 = vpop.eup %2067 }
  0xf2   :  { %v228_v36 = vadd.f32 1.0, %v2068_v35 }
  0xf4   :  { %2069 = vrcp.f32 %v228_v36 }
 0x101   :  { %v2070_v37 = vpop.eup %2069 }
 0x102   :  { %v231_v39 = vmul.f32 %v2070_v37, %v2407_v31 }
 0x104   :  { %v232_v40 = vsub.f32 %v231_v39, %v2413_v38 }
 0x106   :  { %235 = vrot.lane.b32.xlu0 %v232_v40, %s2268_s2  ;;  %v233_v43 = vmul.f32 0.0, %v232_v40 }
 0x178   :  { %v236_v41 = vpop.permute.xlu0 %235 }
 0x179   :  { %v238_v42 = vmul.f32 %v236_v41, %v232_v40 }
 0x17b   :  { %240 = vrot.lane.b32.xlu0 %v238_v42, %s2269_s11 }
 0x1ed   :  { %v241_v44 = vpop.permute.xlu0 %240 }
 0x1ee   :  { %v243_v45 = vadd.f32 %v241_v44, %v233_v43 }
 0x1f0   :  { %2071 = vtanh.f32 %v243_v45 }
 0x1fd   :  { %v2072_v46 = vpop.eup %2071 }
 0x1fe   :  { %246 = vrot.lane.b32.xlu1 %v2072_v46, %s2268_s2 }
 0x270   :  { %v247_v47 = vpop.permute.xlu1 %246 }
 0x271   :  { %v249_v48 = vmul.f32 %v247_v47, %v232_v40 }
 0x273   :  { %251 = vrot.lane.b32.xlu1 %v249_v48, %s2269_s11 }
 0x2e5   :  { %v252_v49 = vpop.permute.xlu1 %251 }
 0x2e6   :  { %2003 = vmatmul.mubr.msk.f32.vlgmr.msra.gmra.mxu0 %vm75_vm3, %v252_v49 }
 0x2e7   :  { %495 = vmatpush1.msra.mxu0 %v2330_v4  ;;  %534 = vmatprep.mubr.f32.mxu0 %v2266_v0 }
 0x2e8   :  { %496 = vmatprep.subr.mxu0 %v2334_v6 }
 0x2e9   :  { %497 = vmatpush1.msra.mxu0 %v2340_v8 }
 0x2ea   :  { %498 = vmatprep.subr.mxu0 %v2346_v10 }
 0x2eb   :  { %499 = vmatpush1.msra.mxu0 %v2350_v12 }
 0x2ec   :  { %500 = vmatprep.subr.mxu0 %v2356_v14 }
 0x2ed   :  { %501 = vmatpush1.msra.mxu0 %v2362_v16 }
 0x2ee   :  { %706 = vmatprep.subr.mxu0 %v2324_v2 }
 0x3a6   :  { %v321_v52 = vpop.f32.mrf.mxu0 }
 0x3a7   :  { %v326_v53 = vadd.f32 %v321_v52, %v2395_v22 }
 0x3a8   :  { %v323_v55 = vpop.f32.mrf.mxu0 }
 0x3a9   :  { %v328_v56 = vadd.f32 %v326_v53, %v216_v26  ;;  %v327_v57 = vadd.f32 %v323_v55, %v2431_v51  ;;  %v543_v53 = vld [vmem:[%s2770_s0 + $0x4] sm:$0x3] }
 0x3ab   :  { %v331_v59 = vadd.f32 %v330_v54, %v328_v56  ;;  %v329_v60 = vadd.f32 %v327_v57, %v218_v58 }
 0x3ad   :  { %v332_v61 = vmul.f32 %v331_v59, %v2407_v31  ;;  %v358_v62 = vmul.f32 %v329_v60, %v2407_v31 }
 0x3af   :  { %v2004_v63 = vmul.f32 -1.442695, %v332_v61  ;;  %v2005_v17 = vmul.f32 -1.442695, %v358_v62 }
 0x3b1   :  { %2073 = vpow2.f32 %v2004_v63 }
 0x3b2   :  { %2075 = vpow2.f32 %v2005_v17 }
 0x3be   :  { %v2074_v18 = vpop.eup %2073 }
 0x3bf   :  { %v2076_v19 = vpop.eup %2075  ;;  %v336_v20 = vadd.f32 1.0, %v2074_v18 }
 0x3c0   :  { %v362_v21 = vadd.f32 1.0, %v2076_v19 }
 0x3c1   :  { %2077 = vrcp.f32 %v336_v20 }
 0x3c2   :  { %2079 = vrcp.f32 %v362_v21 }
 0x3ce   :  { %v2078_v23 = vpop.eup %2077 }
 0x3cf   :  { %v2080_v24 = vpop.eup %2079  ;;  %v339_v25 = vmul.f32 %v2078_v23, %v2407_v31 }
 0x3d0   :  { %v365_v26 = vmul.f32 %v2080_v24, %v2407_v31 }
 0x3d1   :  { %v340_v27 = vsub.f32 %v339_v25, %v2413_v38 }
 0x3d2   :  { %v366_v28 = vsub.f32 %v365_v26, %v2413_v38 }
 0x3d3   :  { %343 = vrot.lane.b32.xlu0 %v340_v27, %s2268_s2  ;;  %v341_v34 = vmul.f32 %v340_v27, %v243_v45 }
 0x3d4   :  { %369 = vrot.lane.b32.xlu1 %v366_v28, %s2268_s2  ;;  %v367_v36 = vmul.f32 0.0, %v366_v28 }
 0x445   :  { %v344_v29 = vpop.permute.xlu0 %343 }
 0x446   :  { %v346_v30 = vmul.f32 %v344_v29, %v340_v27  ;;  %v370_v32 = vpop.permute.xlu1 %369 }
 0x447   :  { %v372_v33 = vmul.f32 %v370_v32, %v366_v28 }
 0x448   :  { %348 = vrot.lane.b32.xlu0 %v346_v30, %s2269_s11 }
 0x449   :  { %374 = vrot.lane.b32.xlu1 %v372_v33, %s2269_s11 }
 0x4ba   :  { %v349_v35 = vpop.permute.xlu0 %348 }
 0x4bb   :  { %v2448_v37 = vadd.f32 %v349_v35, %v341_v34  ;;  %v375_v39 = vpop.permute.xlu1 %374 }
 0x4bc   :  { %v2450_v40 = vadd.f32 %v375_v39, %v367_v36 }
 0x4bd   :  { %2081 = vtanh.f32 %v2448_v37 }
 0x4be   :  { %2083 = vtanh.f32 %v2450_v40 }
 0x4ca   :  { %v2082_v41 = vpop.eup %2081 }
 0x4cb   :  { %v2084_v42 = vpop.eup %2083  ;;  %354 = vrot.lane.b32.xlu0 %v2082_v41, %s2268_s2 }
 0x4cc   :  { %380 = vrot.lane.b32.xlu1 %v2084_v42, %s2268_s2 }
 0x53d   :  { %v355_v43 = vpop.permute.xlu0 %354 }
 0x53e   :  { %v357_v44 = vmul.f32 %v355_v43, %v340_v27  ;;  %v381_v45 = vpop.permute.xlu1 %380 }
 0x53f   :  { %v383_v46 = vmul.f32 %v381_v45, %v366_v28 }
 0x540   :  { %391 = vrot.lane.b32.xlu0 %v357_v44, %s2269_s11 }
 0x541   :  { %385 = vrot.lane.b32.xlu1 %v383_v46, %s2269_s11 }
 0x5b2   :  { %v392_v47 = vpop.permute.xlu0 %391 }
 0x5b3   :  { %v386_v48 = vpop.permute.xlu1 %385  ;;  %2006 = vmatmul.mubr.msk.f32.vlgmr.msra.gmra.mxu1 %vm75_vm3, %v392_v47 }
 0x5b4   :  { %389 = vst.msk [vmem:[#allocation2] sm:$0x3] %vm388_vm4, %v386_v48  ;;  %2007 = vmatmul.mubr.msk.f32.vlgmr.msra.gmra.mxu0 %vm75_vm3, %v386_v48  ;;  %632 = vmatpush1.msra.mxu1 %v2326_v3 }
 0x5b5   :  { %707 = vmatpush1.msra.mxu0 %v2330_v4  ;;  %633 = vmatprep.subr.mxu1 %v2332_v5 }
 0x5b6   :  { %708 = vmatprep.subr.mxu0 %v2334_v6  ;;  %634 = vmatpush1.msra.mxu1 %v2338_v7 }
 0x5b7   :  { %709 = vmatpush1.msra.mxu0 %v2340_v8  ;;  %635 = vmatprep.subr.mxu1 %v2342_v9 }
 0x5b8   :  { %710 = vmatprep.subr.mxu0 %v2346_v10  ;;  %636 = vmatpush1.msra.mxu1 %v2348_v11 }
 0x5b9   :  { %711 = vmatpush1.msra.mxu0 %v2350_v12  ;;  %637 = vmatprep.subr.mxu1 %v2354_v13 }
 0x5ba   :  { %712 = vmatprep.subr.mxu0 %v2356_v14  ;;  %638 = vmatpush1.msra.mxu1 %v2360_v15 }
 0x5bb   :  { %671 = vmatprep.mubr.f32.mxu1 %v2266_v0  ;;  %713 = vmatpush1.msra.mxu0 %v2362_v16 }
 0x5bc   :  { %746 = vmatprep.mubr.f32.mxu0 %v2266_v0  ;;  %843 = vmatprep.subr.mxu1 %v2322_v1 }
 0x5bd   :  { %918 = vmatprep.subr.mxu0 %v2324_v2 }
 0x673   :  { %v461_v49 = vpop.f32.mrf.mxu1 }
 0x674   :  { %v466_v50 = vadd.f32 %v461_v49, %v2395_v22  ;;  %v536_v52 = vpop.f32.mrf.mxu0 }
 0x675   :  { %v463_v54 = vpop.f32.mrf.mxu1 }
 0x676   :  { %v541_v55 = vadd.f32 %v536_v52, %v466_v50  ;;  %v467_v56 = vadd.f32 %v463_v54, %v2431_v51  ;;  %v538_v57 = vpop.f32.mrf.mxu0  ;;  %v755_v52 = vld [vmem:[%s2770_s0 + $0x6] sm:$0x3] }
 0x678   :  { %v544_v58 = vadd.f32 %v543_v53, %v541_v55  ;;  %v542_v59 = vadd.f32 %v538_v57, %v467_v56 }
 0x67a   :  { %v545_v60 = vmul.f32 %v544_v58, %v2407_v31  ;;  %v571_v61 = vmul.f32 %v542_v59, %v2407_v31 }
 0x67c   :  { %v2008_v62 = vmul.f32 -1.442695, %v545_v60  ;;  %v2009_v63 = vmul.f32 -1.442695, %v571_v61 }
 0x67e   :  { %2085 = vpow2.f32 %v2008_v62 }
 0x67f   :  { %2087 = vpow2.f32 %v2009_v63 }
 0x68b   :  { %v2086_v17 = vpop.eup %2085 }
 0x68c   :  { %v2088_v18 = vpop.eup %2087  ;;  %v549_v19 = vadd.f32 1.0, %v2086_v17 }
 0x68d   :  { %v575_v20 = vadd.f32 1.0, %v2088_v18 }
 0x68e   :  { %2089 = vrcp.f32 %v549_v19 }
 0x68f   :  { %2091 = vrcp.f32 %v575_v20 }
 0x69b   :  { %v2090_v21 = vpop.eup %2089 }
 0x69c   :  { %v2092_v23 = vpop.eup %2091  ;;  %v552_v24 = vmul.f32 %v2090_v21, %v2407_v31 }
 0x69d   :  { %v578_v25 = vmul.f32 %v2092_v23, %v2407_v31 }
 0x69e   :  { %v553_v26 = vsub.f32 %v552_v24, %v2413_v38 }
 0x69f   :  { %v579_v27 = vsub.f32 %v578_v25, %v2413_v38 }
 0x6a0   :  { %556 = vrot.lane.b32.xlu0 %v553_v26, %s2268_s2  ;;  %v554_v33 = vmul.f32 %v553_v26, %v2448_v37 }
 0x6a1   :  { %582 = vrot.lane.b32.xlu1 %v579_v27, %s2268_s2  ;;  %v580_v35 = vmul.f32 %v579_v27, %v2450_v40 }
 0x712   :  { %v557_v28 = vpop.permute.xlu0 %556 }
 0x713   :  { %v559_v29 = vmul.f32 %v557_v28, %v553_v26  ;;  %v583_v30 = vpop.permute.xlu1 %582 }
 0x714   :  { %v585_v32 = vmul.f32 %v583_v30, %v579_v27 }
 0x715   :  { %561 = vrot.lane.b32.xlu0 %v559_v29, %s2269_s11 }
 0x716   :  { %587 = vrot.lane.b32.xlu1 %v585_v32, %s2269_s11 }
 0x787   :  { %v562_v34 = vpop.permute.xlu0 %561 }
 0x788   :  { %v2496_v36 = vadd.f32 %v562_v34, %v554_v33  ;;  %v588_v39 = vpop.permute.xlu1 %587 }
 0x789   :  { %v2498_v41 = vadd.f32 %v588_v39, %v580_v35 }
 0x78a   :  { %2093 = vtanh.f32 %v2496_v36 }
 0x78b   :  { %2095 = vtanh.f32 %v2498_v41 }
 0x797   :  { %v2094_v42 = vpop.eup %2093 }
 0x798   :  { %v2096_v43 = vpop.eup %2095  ;;  %567 = vrot.lane.b32.xlu0 %v2094_v42, %s2268_s2 }
 0x799   :  { %593 = vrot.lane.b32.xlu1 %v2096_v43, %s2268_s2 }
 0x80a   :  { %v568_v44 = vpop.permute.xlu0 %567 }
 0x80b   :  { %v570_v37 = vmul.f32 %v568_v44, %v553_v26  ;;  %v594_v45 = vpop.permute.xlu1 %593 }
 0x80c   :  { %v596_v46 = vmul.f32 %v594_v45, %v579_v27 }
 0x80d   :  { %603 = vrot.lane.b32.xlu0 %v570_v37, %s2269_s11 }
 0x80e   :  { %598 = vrot.lane.b32.xlu1 %v596_v46, %s2269_s11 }
 0x87f   :  { %v604_v40 = vpop.permute.xlu0 %603 }
 0x880   :  { %v599_v47 = vpop.permute.xlu1 %598  ;;  %2010 = vmatmul.mubr.msk.f32.vlgmr.msra.gmra.mxu1 %vm75_vm3, %v604_v40 }
 0x881   :  { %601 = vst.msk [vmem:[#allocation2 + $0x2] sm:$0x3] %vm388_vm4, %v599_v47  ;;  %2011 = vmatmul.mubr.msk.f32.vlgmr.msra.gmra.mxu0 %vm75_vm3, %v599_v47  ;;  %844 = vmatpush1.msra.mxu1 %v2326_v3 }
 0x882   :  { %919 = vmatpush1.msra.mxu0 %v2330_v4  ;;  %845 = vmatprep.subr.mxu1 %v2332_v5 }
 0x883   :  { %920 = vmatprep.subr.mxu0 %v2334_v6  ;;  %846 = vmatpush1.msra.mxu1 %v2338_v7 }
 0x884   :  { %921 = vmatpush1.msra.mxu0 %v2340_v8  ;;  %847 = vmatprep.subr.mxu1 %v2342_v9 }
 0x885   :  { %922 = vmatprep.subr.mxu0 %v2346_v10  ;;  %848 = vmatpush1.msra.mxu1 %v2348_v11 }
 0x886   :  { %923 = vmatpush1.msra.mxu0 %v2350_v12  ;;  %849 = vmatprep.subr.mxu1 %v2354_v13 }
 0x887   :  { %924 = vmatprep.subr.mxu0 %v2356_v14  ;;  %850 = vmatpush1.msra.mxu1 %v2360_v15 }
 0x888   :  { %883 = vmatprep.mubr.f32.mxu1 %v2266_v0  ;;  %925 = vmatpush1.msra.mxu0 %v2362_v16 }
 0x889   :  { %958 = vmatprep.mubr.f32.mxu0 %v2266_v0  ;;  %1055 = vmatprep.subr.mxu1 %v2322_v1 }
 0x88a   :  { %1130 = vmatprep.subr.mxu0 %v2324_v2 }
 0x940   :  { %v673_v48 = vpop.f32.mrf.mxu1 }
 0x941   :  { %v678_v49 = vadd.f32 %v673_v48, %v2395_v22  ;;  %v748_v50 = vpop.f32.mrf.mxu0 }
 0x942   :  { %v675_v53 = vpop.f32.mrf.mxu1 }
 0x943   :  { %v753_v54 = vadd.f32 %v748_v50, %v678_v49  ;;  %v679_v55 = vadd.f32 %v675_v53, %v2431_v51  ;;  %v750_v56 = vpop.f32.mrf.mxu0  ;;  %v967_v50 = vld [vmem:[%s2770_s0 + $0x8] sm:$0x3] }
 0x945   :  { %v756_v57 = vadd.f32 %v755_v52, %v753_v54  ;;  %v754_v58 = vadd.f32 %v750_v56, %v679_v55 }
 0x947   :  { %v757_v59 = vmul.f32 %v756_v57, %v2407_v31  ;;  %v783_v60 = vmul.f32 %v754_v58, %v2407_v31 }
 0x949   :  { %v2012_v61 = vmul.f32 -1.442695, %v757_v59  ;;  %v2013_v62 = vmul.f32 -1.442695, %v783_v60 }
 0x94b   :  { %2097 = vpow2.f32 %v2012_v61 }
 0x94c   :  { %2099 = vpow2.f32 %v2013_v62 }
 0x958   :  { %v2098_v63 = vpop.eup %2097 }
 0x959   :  { %v2100_v17 = vpop.eup %2099  ;;  %v761_v18 = vadd.f32 1.0, %v2098_v63 }
 0x95a   :  { %v787_v19 = vadd.f32 1.0, %v2100_v17 }
 0x95b   :  { %2101 = vrcp.f32 %v761_v18 }
 0x95c   :  { %2103 = vrcp.f32 %v787_v19 }
 0x968   :  { %v2102_v20 = vpop.eup %2101 }
 0x969   :  { %v2104_v21 = vpop.eup %2103  ;;  %v764_v23 = vmul.f32 %v2102_v20, %v2407_v31 }
 0x96a   :  { %v790_v24 = vmul.f32 %v2104_v21, %v2407_v31 }
 0x96b   :  { %v765_v25 = vsub.f32 %v764_v23, %v2413_v38 }
 0x96c   :  { %v791_v26 = vsub.f32 %v790_v24, %v2413_v38 }
 0x96d   :  { %768 = vrot.lane.b32.xlu0 %v765_v25, %s2268_s2  ;;  %v766_v32 = vmul.f32 %v765_v25, %v2496_v36 }
 0x96e   :  { %794 = vrot.lane.b32.xlu1 %v791_v26, %s2268_s2  ;;  %v792_v34 = vmul.f32 %v791_v26, %v2498_v41 }
 0x9df   :  { %v769_v27 = vpop.permute.xlu0 %768 }
 0x9e0   :  { %v771_v28 = vmul.f32 %v769_v27, %v765_v25  ;;  %v795_v29 = vpop.permute.xlu1 %794 }
 0x9e1   :  { %v797_v30 = vmul.f32 %v795_v29, %v791_v26 }
 0x9e2   :  { %773 = vrot.lane.b32.xlu0 %v771_v28, %s2269_s11 }
 0x9e3   :  { %799 = vrot.lane.b32.xlu1 %v797_v30, %s2269_s11 }
 0xa54   :  { %v774_v33 = vpop.permute.xlu0 %773 }
 0xa55   :  { %v2544_v35 = vadd.f32 %v774_v33, %v766_v32  ;;  %v800_v39 = vpop.permute.xlu1 %799 }
 0xa56   :  { %v2546_v42 = vadd.f32 %v800_v39, %v792_v34 }
 0xa57   :  { %2105 = vtanh.f32 %v2544_v35 }
 0xa58   :  { %2107 = vtanh.f32 %v2546_v42 }
 0xa64   :  { %v2106_v43 = vpop.eup %2105 }
 0xa65   :  { %v2108_v44 = vpop.eup %2107  ;;  %779 = vrot.lane.b32.xlu0 %v2106_v43, %s2268_s2 }
 0xa66   :  { %805 = vrot.lane.b32.xlu1 %v2108_v44, %s2268_s2 }
 0xad7   :  { %v780_v37 = vpop.permute.xlu0 %779 }
 0xad8   :  { %v782_v36 = vmul.f32 %v780_v37, %v765_v25  ;;  %v806_v45 = vpop.permute.xlu1 %805 }
 0xad9   :  { %v808_v46 = vmul.f32 %v806_v45, %v791_v26 }
 0xada   :  { %815 = vrot.lane.b32.xlu0 %v782_v36, %s2269_s11 }
 0xadb   :  { %810 = vrot.lane.b32.xlu1 %v808_v46, %s2269_s11 }
 0xb4c   :  { %v816_v41 = vpop.permute.xlu0 %815 }
 0xb4d   :  { %v811_v40 = vpop.permute.xlu1 %810  ;;  %2014 = vmatmul.mubr.msk.f32.vlgmr.msra.gmra.mxu1 %vm75_vm3, %v816_v41 }
 0xb4e   :  { %813 = vst.msk [vmem:[#allocation2 + $0x4] sm:$0x3] %vm388_vm4, %v811_v40  ;;  %2015 = vmatmul.mubr.msk.f32.vlgmr.msra.gmra.mxu0 %vm75_vm3, %v811_v40  ;;  %1056 = vmatpush1.msra.mxu1 %v2326_v3 }
 0xb4f   :  { %1131 = vmatpush1.msra.mxu0 %v2330_v4  ;;  %1057 = vmatprep.subr.mxu1 %v2332_v5 }
 0xb50   :  { %1132 = vmatprep.subr.mxu0 %v2334_v6  ;;  %1058 = vmatpush1.msra.mxu1 %v2338_v7 }
 0xb51   :  { %1133 = vmatpush1.msra.mxu0 %v2340_v8  ;;  %1059 = vmatprep.subr.mxu1 %v2342_v9 }
 0xb52   :  { %1134 = vmatprep.subr.mxu0 %v2346_v10  ;;  %1060 = vmatpush1.msra.mxu1 %v2348_v11 }
 0xb53   :  { %1135 = vmatpush1.msra.mxu0 %v2350_v12  ;;  %1061 = vmatprep.subr.mxu1 %v2354_v13 }
 0xb54   :  { %1136 = vmatprep.subr.mxu0 %v2356_v14  ;;  %1062 = vmatpush1.msra.mxu1 %v2360_v15 }
 0xb55   :  { %1095 = vmatprep.mubr.f32.mxu1 %v2266_v0  ;;  %1137 = vmatpush1.msra.mxu0 %v2362_v16 }
 0xb56   :  { %1170 = vmatprep.mubr.f32.mxu0 %v2266_v0  ;;  %1267 = vmatprep.subr.mxu1 %v2322_v1 }
 0xb57   :  { %1342 = vmatprep.subr.mxu0 %v2324_v2 }
 0xc0d   :  { %v885_v47 = vpop.f32.mrf.mxu1 }
 0xc0e   :  { %v890_v48 = vadd.f32 %v885_v47, %v2395_v22  ;;  %v960_v49 = vpop.f32.mrf.mxu0 }
 0xc0f   :  { %v887_v52 = vpop.f32.mrf.mxu1 }
 0xc10   :  { %v965_v53 = vadd.f32 %v960_v49, %v890_v48  ;;  %v891_v54 = vadd.f32 %v887_v52, %v2431_v51  ;;  %v962_v55 = vpop.f32.mrf.mxu0  ;;  %v1179_v49 = vld [vmem:[%s2770_s0 + $0xa] sm:$0x3] }
 0xc12   :  { %v968_v56 = vadd.f32 %v967_v50, %v965_v53  ;;  %v966_v57 = vadd.f32 %v962_v55, %v891_v54 }
 0xc14   :  { %v969_v58 = vmul.f32 %v968_v56, %v2407_v31  ;;  %v995_v59 = vmul.f32 %v966_v57, %v2407_v31 }
 0xc16   :  { %v2016_v60 = vmul.f32 -1.442695, %v969_v58  ;;  %v2017_v61 = vmul.f32 -1.442695, %v995_v59 }
 0xc18   :  { %2109 = vpow2.f32 %v2016_v60 }
 0xc19   :  { %2111 = vpow2.f32 %v2017_v61 }
 0xc25   :  { %v2110_v62 = vpop.eup %2109 }
 0xc26   :  { %v2112_v63 = vpop.eup %2111  ;;  %v973_v17 = vadd.f32 1.0, %v2110_v62 }
 0xc27   :  { %v999_v18 = vadd.f32 1.0, %v2112_v63 }
 0xc28   :  { %2113 = vrcp.f32 %v973_v17 }
 0xc29   :  { %2115 = vrcp.f32 %v999_v18 }
 0xc35   :  { %v2114_v19 = vpop.eup %2113 }
 0xc36   :  { %v2116_v20 = vpop.eup %2115  ;;  %v976_v21 = vmul.f32 %v2114_v19, %v2407_v31 }
 0xc37   :  { %v1002_v23 = vmul.f32 %v2116_v20, %v2407_v31 }
 0xc38   :  { %v977_v24 = vsub.f32 %v976_v21, %v2413_v38 }
 0xc39   :  { %v1003_v25 = vsub.f32 %v1002_v23, %v2413_v38 }
 0xc3a   :  { %980 = vrot.lane.b32.xlu0 %v977_v24, %s2268_s2  ;;  %v978_v30 = vmul.f32 %v977_v24, %v2544_v35 }
 0xc3b   :  { %1006 = vrot.lane.b32.xlu1 %v1003_v25, %s2268_s2  ;;  %v1004_v33 = vmul.f32 %v1003_v25, %v2546_v42 }
 0xcac   :  { %v981_v26 = vpop.permute.xlu0 %980 }
 0xcad   :  { %v983_v27 = vmul.f32 %v981_v26, %v977_v24  ;;  %v1007_v28 = vpop.permute.xlu1 %1006 }
 0xcae   :  { %v1009_v29 = vmul.f32 %v1007_v28, %v1003_v25 }
 0xcaf   :  { %985 = vrot.lane.b32.xlu0 %v983_v27, %s2269_s11 }
 0xcb0   :  { %1011 = vrot.lane.b32.xlu1 %v1009_v29, %s2269_s11 }
 0xd21   :  { %v986_v32 = vpop.permute.xlu0 %985 }
 0xd22   :  { %v2592_v34 = vadd.f32 %v986_v32, %v978_v30  ;;  %v1012_v39 = vpop.permute.xlu1 %1011 }
 0xd23   :  { %v2594_v43 = vadd.f32 %v1012_v39, %v1004_v33 }
 0xd24   :  { %2117 = vtanh.f32 %v2592_v34 }
 0xd25   :  { %2119 = vtanh.f32 %v2594_v43 }
 0xd31   :  { %v2118_v44 = vpop.eup %2117 }
 0xd32   :  { %v2120_v37 = vpop.eup %2119  ;;  %991 = vrot.lane.b32.xlu0 %v2118_v44, %s2268_s2 }
 0xd33   :  { %1017 = vrot.lane.b32.xlu1 %v2120_v37, %s2268_s2 }
 0xda4   :  { %v992_v36 = vpop.permute.xlu0 %991 }
 0xda5   :  { %v994_v35 = vmul.f32 %v992_v36, %v977_v24  ;;  %v1018_v45 = vpop.permute.xlu1 %1017 }
 0xda6   :  { %v1020_v46 = vmul.f32 %v1018_v45, %v1003_v25 }
 0xda7   :  { %1027 = vrot.lane.b32.xlu0 %v994_v35, %s2269_s11 }
 0xda8   :  { %1022 = vrot.lane.b32.xlu1 %v1020_v46, %s2269_s11 }
 0xe19   :  { %v1028_v42 = vpop.permute.xlu0 %1027 }
 0xe1a   :  { %v1023_v41 = vpop.permute.xlu1 %1022  ;;  %2018 = vmatmul.mubr.msk.f32.vlgmr.msra.gmra.mxu1 %vm75_vm3, %v1028_v42 }
 0xe1b   :  { %1025 = vst.msk [vmem:[#allocation2 + $0x6] sm:$0x3] %vm388_vm4, %v1023_v41  ;;  %2019 = vmatmul.mubr.msk.f32.vlgmr.msra.gmra.mxu0 %vm75_vm3, %v1023_v41  ;;  %1268 = vmatpush1.msra.mxu1 %v2326_v3 }
 0xe1c   :  { %1343 = vmatpush1.msra.mxu0 %v2330_v4  ;;  %1269 = vmatprep.subr.mxu1 %v2332_v5 }
 0xe1d   :  { %1344 = vmatprep.subr.mxu0 %v2334_v6  ;;  %1270 = vmatpush1.msra.mxu1 %v2338_v7 }
 0xe1e   :  { %1345 = vmatpush1.msra.mxu0 %v2340_v8  ;;  %1271 = vmatprep.subr.mxu1 %v2342_v9 }
 0xe1f   :  { %1346 = vmatprep.subr.mxu0 %v2346_v10  ;;  %1272 = vmatpush1.msra.mxu1 %v2348_v11 }
 0xe20   :  { %1347 = vmatpush1.msra.mxu0 %v2350_v12  ;;  %1273 = vmatprep.subr.mxu1 %v2354_v13 }
 0xe21   :  { %1348 = vmatprep.subr.mxu0 %v2356_v14  ;;  %1274 = vmatpush1.msra.mxu1 %v2360_v15 }
 0xe22   :  { %1307 = vmatprep.mubr.f32.mxu1 %v2266_v0  ;;  %1349 = vmatpush1.msra.mxu0 %v2362_v16 }
 0xe23   :  { %1382 = vmatprep.mubr.f32.mxu0 %v2266_v0  ;;  %1479 = vmatprep.subr.mxu1 %v2322_v1 }
 0xe24   :  { %1554 = vmatprep.subr.mxu0 %v2324_v2 }
 0xeda   :  { %v1097_v40 = vpop.f32.mrf.mxu1 }
 0xedb   :  { %v1102_v47 = vadd.f32 %v1097_v40, %v2395_v22  ;;  %v1172_v48 = vpop.f32.mrf.mxu0 }
 0xedc   :  { %v1099_v50 = vpop.f32.mrf.mxu1 }
 0xedd   :  { %v1177_v52 = vadd.f32 %v1172_v48, %v1102_v47  ;;  %v1103_v53 = vadd.f32 %v1099_v50, %v2431_v51  ;;  %v1174_v54 = vpop.f32.mrf.mxu0 }
 0xedf   :  { %v1180_v55 = vadd.f32 %v1179_v49, %v1177_v52  ;;  %v1178_v56 = vadd.f32 %v1174_v54, %v1103_v53 }
 0xee1   :  { %v1181_v57 = vmul.f32 %v1180_v55, %v2407_v31  ;;  %v1207_v58 = vmul.f32 %v1178_v56, %v2407_v31 }
 0xee3   :  { %v2020_v59 = vmul.f32 -1.442695, %v1181_v57  ;;  %v2021_v60 = vmul.f32 -1.442695, %v1207_v58 }
 0xee5   :  { %2121 = vpow2.f32 %v2020_v59 }
 0xee6   :  { %2123 = vpow2.f32 %v2021_v60 }
 0xef2   :  { %v2122_v61 = vpop.eup %2121 }
 0xef3   :  { %v2124_v62 = vpop.eup %2123  ;;  %v1185_v63 = vadd.f32 1.0, %v2122_v61 }
 0xef4   :  { %v1211_v17 = vadd.f32 1.0, %v2124_v62 }
 0xef5   :  { %2125 = vrcp.f32 %v1185_v63 }
 0xef6   :  { %2127 = vrcp.f32 %v1211_v17 }
 0xf02   :  { %v2126_v18 = vpop.eup %2125 }
 0xf03   :  { %v2128_v19 = vpop.eup %2127  ;;  %v1188_v20 = vmul.f32 %v2126_v18, %v2407_v31 }
 0xf04   :  { %v1214_v21 = vmul.f32 %v2128_v19, %v2407_v31 }
 0xf05   :  { %v1189_v23 = vsub.f32 %v1188_v20, %v2413_v38 }
 0xf06   :  { %v1215_v24 = vsub.f32 %v1214_v21, %v2413_v38 }
 0xf07   :  { %1192 = vrot.lane.b32.xlu0 %v1189_v23, %s2268_s2  ;;  %v1190_v29 = vmul.f32 %v1189_v23, %v2592_v34 }
 0xf08   :  { %1218 = vrot.lane.b32.xlu1 %v1215_v24, %s2268_s2  ;;  %v1216_v32 = vmul.f32 %v1215_v24, %v2594_v43 }
 0xf79   :  { %v1193_v25 = vpop.permute.xlu0 %1192 }
 0xf7a   :  { %v1195_v26 = vmul.f32 %v1193_v25, %v1189_v23  ;;  %v1219_v27 = vpop.permute.xlu1 %1218 }
 0xf7b   :  { %v1221_v28 = vmul.f32 %v1219_v27, %v1215_v24  ;;  %v2164_v27 = vld [vmem:[#allocation3 + $0x70] sm:$0xff] }
 0xf7c   :  { %1197 = vrot.lane.b32.xlu0 %v1195_v26, %s2269_s11  ;;  %v2163_v26 = vld [vmem:[#allocation3 + $0x30] sm:$0xff] }
 0xf7d   :  { %1223 = vrot.lane.b32.xlu1 %v1221_v28, %s2269_s11  ;;  %v2165_v28 = vld [vmem:[#allocation3 + $0x28] sm:$0xff] }
 0xfee   :  { %v1198_v30 = vpop.permute.xlu0 %1197 }
 0xfef   :  { %v2640_v33 = vadd.f32 %v1198_v30, %v1190_v29  ;;  %v1224_v39 = vpop.permute.xlu1 %1223  ;;  %v2166_v29 = vld [vmem:[#allocation3 + $0x68] sm:$0xff]  ;;  %v2167_v30 = vld [vmem:[#allocation3 + $0x20] sm:$0xff] }
 0xff0   :  { %v2642_v44 = vadd.f32 %v1224_v39, %v1216_v32  ;;  %v2168_v32 = vld [vmem:[#allocation3 + $0x60] sm:$0xff]  ;;  %v2170_v39 = vld [vmem:[#allocation3 + $0x58] sm:$0xff] }
 0xff1   :  { %2129 = vtanh.f32 %v2640_v33 }
 0xff2   :  { %2131 = vtanh.f32 %v2642_v44 }
 0xffe   :  { %v2130_v37 = vpop.eup %2129 }
 0xfff   :  { %v2132_v36 = vpop.eup %2131  ;;  %1203 = vrot.lane.b32.xlu0 %v2130_v37, %s2268_s2  ;;  %v2172_v37 = vld [vmem:[#allocation3 + $0x50] sm:$0xff] }
0x1000   :  { %1229 = vrot.lane.b32.xlu1 %v2132_v36, %s2268_s2  ;;  %v2173_v36 = vld [vmem:[#allocation3 + $0x8] sm:$0xff] }
0x1071   :  { %v1204_v35 = vpop.permute.xlu0 %1203 }
0x1072   :  { %v1206_v34 = vmul.f32 %v1204_v35, %v1189_v23  ;;  %v1230_v45 = vpop.permute.xlu1 %1229  ;;  %v2174_v35 = vld [vmem:[#allocation3 + $0x48] sm:$0xff] }
0x1073   :  { %v1232_v46 = vmul.f32 %v1230_v45, %v1215_v24  ;;  %v2176_v45 = vld [vmem:[#allocation3 + $0x40] sm:$0xff] }
0x1074   :  { %1239 = vrot.lane.b32.xlu0 %v1206_v34, %s2269_s11  ;;  %v2175_v34 = vld [vmem:[#allocation3] sm:$0xff] }
0x1075   :  { %1234 = vrot.lane.b32.xlu1 %v1232_v46, %s2269_s11 }
0x10e6   :  { %v1240_v43 = vpop.permute.xlu0 %1239 }
0x10e7   :  { %v1235_v42 = vpop.permute.xlu1 %1234  ;;  %2022 = vmatmul.mubr.msk.f32.vlgmr.msra.gmra.mxu1 %vm75_vm3, %v1240_v43 }
0x10e8   :  { %1237 = vst.msk [vmem:[#allocation2 + $0x8] sm:$0x3] %vm388_vm4, %v1235_v42  ;;  %2023 = vmatmul.mubr.msk.f32.vlgmr.msra.gmra.mxu0 %vm75_vm3, %v1235_v42  ;;  %1480 = vmatpush1.msra.mxu1 %v2326_v3 }
0x10e9   :  { %1555 = vmatpush1.msra.mxu0 %v2330_v4  ;;  %1481 = vmatprep.subr.mxu1 %v2332_v5 }
0x10ea   :  { %1556 = vmatprep.subr.mxu0 %v2334_v6  ;;  %1482 = vmatpush1.msra.mxu1 %v2338_v7  ;;  %v1391_v6 = vld [vmem:[%s2770_s0 + $0xc] sm:$0x3] }
0x10eb   :  { %1557 = vmatpush1.msra.mxu0 %v2340_v8  ;;  %1483 = vmatprep.subr.mxu1 %v2342_v9 }
0x10ec   :  { %1558 = vmatprep.subr.mxu0 %v2346_v10  ;;  %1484 = vmatpush1.msra.mxu1 %v2348_v11 }
0x10ed   :  { %1559 = vmatpush1.msra.mxu0 %v2350_v12  ;;  %1485 = vmatprep.subr.mxu1 %v2354_v13 }
0x10ee   :  { %1560 = vmatprep.subr.mxu0 %v2356_v14  ;;  %1486 = vmatpush1.msra.mxu1 %v2360_v15 }
0x10ef   :  { %1519 = vmatprep.mubr.f32.mxu1 %v2266_v0  ;;  %1561 = vmatpush1.msra.mxu0 %v2362_v16 }
0x10f0   :  { %1594 = vmatprep.mubr.f32.mxu0 %v2266_v0  ;;  %1691 = vmatprep.subr.mxu1 %v2322_v1 }
0x10f1   :  { %1764 = vmatprep.subr.mxu0 %v2324_v2 }
0x11a7   :  { %v1309_v3 = vpop.f32.mrf.mxu1 }
0x11a8   :  { %v1314_v4 = vadd.f32 %v1309_v3, %v2395_v22  ;;  %v1384_v5 = vpop.f32.mrf.mxu0  ;;  %v1603_v3 = vld [vmem:[%s2770_s0 + $0xe] sm:$0x3]  ;;  %s2270_s0 = smov 96  }
0x11a9   :  { %v1311_v7 = vpop.f32.mrf.mxu1 }
0x11aa   :  { %v1389_v8 = vadd.f32 %v1384_v5, %v1314_v4  ;;  %v1315_v9 = vadd.f32 %v1311_v7, %v2431_v51  ;;  %v1386_v10 = vpop.f32.mrf.mxu0 }
0x11ac   :  { %v1392_v11 = vadd.f32 %v1391_v6, %v1389_v8  ;;  %v1390_v12 = vadd.f32 %v1386_v10, %v1315_v9 }
0x11ae   :  { %v1393_v13 = vmul.f32 %v1392_v11, %v2407_v31  ;;  %v1419_v1 = vmul.f32 %v1390_v12, %v2407_v31 }
0x11b0   :  { %v2024_v2 = vmul.f32 -1.442695, %v1393_v13  ;;  %v2025_v14 = vmul.f32 -1.442695, %v1419_v1 }
0x11b2   :  { %2133 = vpow2.f32 %v2024_v2 }
0x11b3   :  { %2135 = vpow2.f32 %v2025_v14 }
0x11bf   :  { %v2134_v15 = vpop.eup %2133 }
0x11c0   :  { %v2136_v16 = vpop.eup %2135  ;;  %v1397_v41 = vadd.f32 1.0, %v2134_v15 }
0x11c1   :  { %v1423_v40 = vadd.f32 1.0, %v2136_v16 }
0x11c2   :  { %2137 = vrcp.f32 %v1397_v41 }
0x11c3   :  { %2139 = vrcp.f32 %v1423_v40 }
0x11cf   :  { %v2138_v47 = vpop.eup %2137 }
0x11d0   :  { %v2140_v48 = vpop.eup %2139  ;;  %v1400_v49 = vmul.f32 %v2138_v47, %v2407_v31 }
0x11d1   :  { %v1426_v50 = vmul.f32 %v2140_v48, %v2407_v31 }
0x11d2   :  { %v1401_v52 = vsub.f32 %v1400_v49, %v2413_v38 }
0x11d3   :  { %v1427_v53 = vsub.f32 %v1426_v50, %v2413_v38 }
0x11d4   :  { %1404 = vrot.lane.b32.xlu0 %v1401_v52, %s2268_s2  ;;  %v1402_v58 = vmul.f32 %v1401_v52, %v2640_v33  ;;  %v2169_v33 = vld [vmem:[#allocation3 + $0x18] sm:$0xff] }
0x11d5   :  { %1430 = vrot.lane.b32.xlu1 %v1427_v53, %s2268_s2  ;;  %v1428_v60 = vmul.f32 %v1427_v53, %v2642_v44  ;;  %v2171_v44 = vld [vmem:[#allocation3 + $0x10] sm:$0xff] }
0x1246   :  { %v1405_v54 = vpop.permute.xlu0 %1404 }
0x1247   :  { %v1407_v55 = vmul.f32 %v1405_v54, %v1401_v52  ;;  %v1431_v56 = vpop.permute.xlu1 %1430 }
0x1248   :  { %v1433_v57 = vmul.f32 %v1431_v56, %v1427_v53 }
0x1249   :  { %1409 = vrot.lane.b32.xlu0 %v1407_v55, %s2269_s11 }
0x124a   :  { %1435 = vrot.lane.b32.xlu1 %v1433_v57, %s2269_s11 }
0x12bb   :  { %v1410_v59 = vpop.permute.xlu0 %1409 }
0x12bc   :  { %v2688_v61 = vadd.f32 %v1410_v59, %v1402_v58  ;;  %v1436_v62 = vpop.permute.xlu1 %1435 }
0x12bd   :  { %v2690_v63 = vadd.f32 %v1436_v62, %v1428_v60 }
0x12be   :  { %2141 = vtanh.f32 %v2688_v61 }
0x12bf   :  { %2143 = vtanh.f32 %v2690_v63 }
0x12cb   :  { %v2142_v17 = vpop.eup %2141 }
0x12cc   :  { %v2144_v18 = vpop.eup %2143  ;;  %1415 = vrot.lane.b32.xlu0 %v2142_v17, %s2268_s2 }
0x12cd   :  { %1441 = vrot.lane.b32.xlu1 %v2144_v18, %s2268_s2 }
0x133e   :  { %v1416_v19 = vpop.permute.xlu0 %1415 }
0x133f   :  { %v1418_v20 = vmul.f32 %v1416_v19, %v1401_v52  ;;  %v1442_v21 = vpop.permute.xlu1 %1441 }
0x1340   :  { %v1444_v23 = vmul.f32 %v1442_v21, %v1427_v53 }
0x1341   :  { %1451 = vrot.lane.b32.xlu0 %v1418_v20, %s2269_s11  ;;  %v1842_v20 = vld [vmem:[#allocation2] sm:$0xff] }
0x1342   :  { %1446 = vrot.lane.b32.xlu1 %v1444_v23, %s2269_s11 }
0x13b3   :  { %v1452_v24 = vpop.permute.xlu0 %1451 }
0x13b4   :  { %v1447_v25 = vpop.permute.xlu1 %1446  ;;  %2026 = vmatmul.mubr.msk.f32.vlgmr.msra.gmra.mxu1 %vm75_vm3, %v1452_v24 }
0x13b5   :  { %1449 = vst.msk [vmem:[#allocation2 + $0xa] sm:$0x3] %vm388_vm4, %v1447_v25  ;;  %2027 = vmatmul.mubr.msk.f32.vlgmr.msra.gmra.mxu0 %vm75_vm3, %v1447_v25  ;;  %1692 = vmatpush1.msra.mxu1 %v2163_v26 }
0x13b6   :  { %1765 = vmatpush1.msra.mxu0 %v2164_v27  ;;  %1693 = vmatprep.subr.mxu1 %v2165_v28 }
0x13b7   :  { %1766 = vmatprep.subr.mxu0 %v2166_v29  ;;  %1694 = vmatpush1.msra.mxu1 %v2167_v30 }
0x13b8   :  { %1767 = vmatpush1.msra.mxu0 %v2168_v32  ;;  %1695 = vmatprep.subr.mxu1 %v2169_v33 }
0x13b9   :  { %1768 = vmatprep.subr.mxu0 %v2170_v39  ;;  %1696 = vmatpush1.msra.mxu1 %v2171_v44 }
0x13ba   :  { %1769 = vmatpush1.msra.mxu0 %v2172_v37  ;;  %1697 = vmatprep.subr.mxu1 %v2173_v36 }
0x13bb   :  { %1770 = vmatprep.subr.mxu0 %v2174_v35  ;;  %1698 = vmatpush1.msra.mxu1 %v2175_v34 }
0x13bc   :  { %1731 = vmatprep.mubr.f32.mxu1 %v2266_v0  ;;  %1771 = vmatpush1.msra.mxu0 %v2176_v45 }
0x13bd   :  { %1804 = vmatprep.mubr.f32.mxu0 %v2266_v0 }
0x1474   :  { %v1521_v46 = vpop.f32.mrf.mxu1 }
0x1475   :  { %v1526_v43 = vadd.f32 %v1521_v46, %v2395_v22  ;;  %v1596_v42 = vpop.f32.mrf.mxu0  ;;  %v1845_v46 = vld [vmem:[%s2773_s3 + $0x8] sm:$0xff] }
0x1476   :  { %v1523_v4 = vpop.f32.mrf.mxu1 }
0x1477   :  { %v1601_v5 = vadd.f32 %v1596_v42, %v1526_v43  ;;  %v1527_v6 = vadd.f32 %v1523_v4, %v2431_v51  ;;  %v1598_v7 = vpop.f32.mrf.mxu0  ;;  %v1844_v43 = vld [vmem:[%s2773_s3] sm:$0xff] }
0x1479   :  { %v1604_v8 = vadd.f32 %v1603_v3, %v1601_v5  ;;  %v1602_v9 = vadd.f32 %v1598_v7, %v1527_v6 }
0x147b   :  { %v1605_v10 = vmul.f32 %v1604_v8, %v2407_v31  ;;  %v1631_v11 = vmul.f32 %v1602_v9, %v2407_v31 }
0x147d   :  { %v2028_v0 = vmul.f32 -1.442695, %v1605_v10  ;;  %v2029_v12 = vmul.f32 -1.442695, %v1631_v11 }
0x147f   :  { %2145 = vpow2.f32 %v2028_v0 }
0x1480   :  { %2147 = vpow2.f32 %v2029_v12 }
0x148c   :  { %v2146_v22 = vpop.eup %2145 }
0x148d   :  { %v2148_v13 = vpop.eup %2147  ;;  %v1609_v1 = vadd.f32 1.0, %v2146_v22 }
0x148e   :  { %v1635_v2 = vadd.f32 1.0, %v2148_v13 }
0x148f   :  { %2149 = vrcp.f32 %v1609_v1 }
0x1490   :  { %2151 = vrcp.f32 %v1635_v2 }
0x149c   :  { %v2150_v14 = vpop.eup %2149 }
0x149d   :  { %v2152_v15 = vpop.eup %2151  ;;  %v1612_v16 = vmul.f32 %v2150_v14, %v2407_v31 }
0x149e   :  { %v1638_v41 = vmul.f32 %v2152_v15, %v2407_v31 }
0x149f   :  { %v1613_v40 = vsub.f32 %v1612_v16, %v2413_v38 }
0x14a0   :  { %v1639_v47 = vsub.f32 %v1638_v41, %v2413_v38 }
0x14a1   :  { %1616 = vrot.lane.b32.xlu0 %v1613_v40, %s2268_s2  ;;  %v1614_v53 = vmul.f32 %v1613_v40, %v2688_v61 }
0x14a2   :  { %1642 = vrot.lane.b32.xlu1 %v1639_v47, %s2268_s2  ;;  %v1640_v55 = vmul.f32 %v1639_v47, %v2690_v63 }
0x1513   :  { %v1617_v48 = vpop.permute.xlu0 %1616 }
0x1514   :  { %v1619_v49 = vmul.f32 %v1617_v48, %v1613_v40  ;;  %v1643_v50 = vpop.permute.xlu1 %1642 }
0x1515   :  { %v1645_v52 = vmul.f32 %v1643_v50, %v1639_v47 }
0x1516   :  { %1621 = vrot.lane.b32.xlu0 %v1619_v49, %s2269_s11 }
0x1517   :  { %1647 = vrot.lane.b32.xlu1 %v1645_v52, %s2269_s11 }
0x1588   :  { %v1622_v54 = vpop.permute.xlu0 %1621 }
0x1589   :  { %v1624_v56 = vadd.f32 %v1622_v54, %v1614_v53  ;;  %v1648_v57 = vpop.permute.xlu1 %1647 }
0x158a   :  { %v1650_v58 = vadd.f32 %v1648_v57, %v1640_v55 }
0x158b   :  { %2153 = vtanh.f32 %v1624_v56 }
0x158c   :  { %2155 = vtanh.f32 %v1650_v58 }
0x1598   :  { %v2154_v59 = vpop.eup %2153 }
0x1599   :  { %v2156_v60 = vpop.eup %2155  ;;  %1627 = vrot.lane.b32.xlu0 %v2154_v59, %s2268_s2 }
0x159a   :  { %1653 = vrot.lane.b32.xlu1 %v2156_v60, %s2268_s2 }
0x160b   :  { %v1628_v62 = vpop.permute.xlu0 %1627 }
0x160c   :  { %v1630_v17 = vmul.f32 %v1628_v62, %v1613_v40  ;;  %v1654_v18 = vpop.permute.xlu1 %1653 }
0x160d   :  { %v1656_v19 = vmul.f32 %v1654_v18, %v1639_v47 }
0x160e   :  { %1663 = vrot.lane.b32.xlu0 %v1630_v17, %s2269_s11 }
0x160f   :  { %1658 = vrot.lane.b32.xlu1 %v1656_v19, %s2269_s11 }
0x1680   :  { %v1664_v61 = vpop.permute.xlu0 %1663 }
0x1681   :  { %1940 = vst.msk [vmem:[#allocation7] sm:$0x3] %vm388_vm4, %v1664_v61  ;;  %v1659_v63 = vpop.permute.xlu1 %1658  ;;  %2030 = vmatmul.mubr.msk.f32.vlgmr.msra.gmra.mxu1 %vm75_vm3, %v1664_v61 }
0x1682   :  { %1661 = vst.msk [vmem:[#allocation2 + $0xc] sm:$0x3] %vm388_vm4, %v1659_v63  ;;  %2031 = vmatmul.mubr.msk.f32.vlgmr.msra.gmra.mxu0 %vm75_vm3, %v1659_v63  ;;  %2050 = vmatprep.mubr.msk.f32.mxu1 %vm75_vm3, %v1842_v20 }
0x1741   :  { %v1733_v21 = vpop.f32.mrf.mxu1 }
0x1742   :  { %v1806_v23 = vpop.f32.mrf.mxu0 }
0x1743   :  { %v1734_v24 = vpop.f32.mrf.mxu1 }
0x1744   :  { %v1737_v25 = vadd.f32 %v1734_v24, %v2431_v51  ;;  %v1807_v26 = vpop.f32.mrf.mxu0 }
0x1746   :  { %v1810_v27 = vadd.f32 %v1807_v26, %v1737_v25 }
0x1748   :  { %v1811_v28 = vmul.f32 %v1810_v27, %v2407_v31 }
0x174a   :  { %v2032_v29 = vmul.f32 -1.442695, %v1811_v28 }
0x174c   :  { %2157 = vpow2.f32 %v2032_v29 }
0x1759   :  { %v2158_v30 = vpop.eup %2157 }
0x175a   :  { %v1815_v32 = vadd.f32 1.0, %v2158_v30 }
0x175c   :  { %2159 = vrcp.f32 %v1815_v32 }
0x1769   :  { %v2160_v33 = vpop.eup %2159 }
0x176a   :  { %v1818_v39 = vmul.f32 %v2160_v33, %v2407_v31  ;;  %v1847_v31 = vld [vmem:[%s2773_s3 + $0x18] sm:$0xff] }
0x176b   :  { %2042 = vmatprep.subr.mxu1 %v1847_v31 }
0x176c   :  { %v1819_v44 = vsub.f32 %v1818_v39, %v2413_v38  ;;  %v1846_v38 = vld [vmem:[%s2773_s3 + $0x10] sm:$0xff]  ;;  %2043 = vmatpush3.msra.mxu1 %v1847_v31  ;;  %s2271_s3 = smov [#allocation7]  }
0x176d   :  { %2044 = vmatprep.subr.mxu1 %v1846_v38  ;;  %s1971_s10 = sshll.u32 %s2271_s3, 4  ;;  %s1972_s10 = int_to_ptr.vmem [resolvable:$true] %s1971_s10 }
0x176e   :  { %1822 = vrot.lane.b32.xlu0 %v1819_v44, %s2268_s2  ;;  %v1820_v51 = vmul.f32 %v1819_v44, %v1650_v58  ;;  %2045 = vmatpush3.msra.mxu1 %v1846_v38  ;;  %p2202_p6 = scmp.lt.s32.totalorder %s1972_s10, %s1972_s10 }
0x176f   :  { %2046 = vmatprep.subr.mxu1 %v1845_v46 }
0x1770   :  { %2047 = vmatpush3.msra.mxu1 %v1845_v46 }
0x1771   :  { %2048 = vmatprep.subr.mxu1 %v1844_v43 }
0x1772   :  { %2049 = vmatpush3.msra.mxu1 %v1844_v43 }
0x17e0   :  { %v1823_v37 = vpop.permute.xlu0 %1822 }
0x17e1   :  { %v1825_v36 = vmul.f32 %v1823_v37, %v1819_v44 }
0x17e3   :  { %1827 = vrot.lane.b32.xlu1 %v1825_v36, %s2269_s11 }
0x1855   :  { %v1828_v35 = vpop.permute.xlu1 %1827 }
0x1856   :  { %v1830_v34 = vadd.f32 %v1828_v35, %v1820_v51 }
0x1858   :  { %2161 = vtanh.f32 %v1830_v34 }
0x1865   :  { %v2162_v45 = vpop.eup %2161 }
0x1866   :  { %1833 = vrot.lane.b32.xlu0 %v2162_v45, %s2268_s2  ;;  %s2197_s2 = scalar_lea.vmem %s1972_s10, 64 }
0x1867   :  { %p2198_p5 = scmp.ne.s32.totalorder %s1972_s10, %s2197_s2  ;;  %p2203_p7 = scmp.lt.s32.totalorder %s2197_s2, %s2197_s2 }
0x1869   :  { %p2204_p8 = por %p2203_p7, %p2202_p6 }
0x186a   :  { %1942 = vrot.lane.b32.xlu0 %v1624_v56, %s2270_s0 }
0x186b   :  { %p2205_p9 = pnand %p2204_p8, %p2198_p5 }
0x18d8   :  { %v1834_v42 = vpop.permute.xlu0 %1833 }
0x18d9   :  { %v1836_v3 = vmul.f32 %v1834_v42, %v1819_v44 }
0x18db   :  { %1838 = vrot.lane.b32.xlu1 %v1836_v3, %s2269_s11 }
0x18dc   :  { %v1943_v4 = vpop.permute.xlu0 %1942 }
0x18dd   :  { %1945 = vst.msk [vmem:[#allocation9] sm:$0x3] %vm388_vm4, %v1943_v4 }
0x18df   :  { %1949 = vrot.lane.b32.xlu1 %v1830_v34, %s2270_s0 }
0x194d   :  { %v1839_v5 = vpop.permute.xlu1 %1838 }
0x194e   :  { %1841 = vst.msk [vmem:[#allocation2 + $0xe] sm:$0x3] %vm388_vm4, %v1839_v5  ;;  %1947 = vst.msk [vmem:[#allocation7 + $0x2] sm:$0x3] %vm388_vm4, %v1839_v5 }
0x1951   :  { %v1950_v6 = vpop.permute.xlu1 %1949 }
0x1952   :  { %1953 = vst.msk [vmem:[#allocation9 + $0x2] sm:$0x3] %vm388_vm4, %v1950_v6 }
0x1955   :  { %v1843_v7 = vld [vmem:[#allocation2 + $0x8] sm:$0xff] }
0x1956   :  { %2051 = vmatmul.mubr.msk.f32.vlgmr.msra.gmra.mxu1 %vm75_vm3, %v1843_v7 }
0x1957   :  { %2208 = shalt.err (!%p2205_p9)
}
0x1958   :  { %s2272_s12 = smov 2   ;;  %s2273_s15 = smov [#allocation9]  }
0x1959   :  { %1977 = dma.vmem_to_hbm [thread:$0]  %s1972_s10, 64, %s2776_s6, [#allocation8], %s2269_s11, %s2269_s11, %s2272_s12  }
0x195a   :  { %s1983_s16 = sshll.u32 %s2273_s15, 4  ;;  %s1984_s16 = int_to_ptr.vmem [resolvable:$true] %s1983_s16 }
0x195b   :  { %s2217_s17 = scalar_lea.vmem %s1984_s16, 64  ;;  %p2222_p11 = scmp.lt.s32.totalorder %s1984_s16, %s1984_s16 }
0x195c   :  { %p2218_p10 = scmp.ne.s32.totalorder %s1984_s16, %s2217_s17  ;;  %p2223_p12 = scmp.lt.s32.totalorder %s2217_s17, %s2217_s17 }
0x195e   :  { %p2224_p13 = por %p2223_p12, %p2222_p11 }
0x1960   :  { %p2225_p0 = pnand %p2224_p13, %p2218_p10 }
0x1962   :  { %2228 = shalt.err (!%p2225_p0)
}
0x1963   :  { %1989 = dma.vmem_to_hbm [thread:$0]  %s1984_s16, 64, %s2777_s7, [#allocation8], %s2269_s11, %s2269_s11, %s2272_s12   ;;  %vm1936_vm5 = vcmask 130048  }
0x1964   :  { %v2033_v8 = vld [vmem:[%s2774_s4] ss:$0 sm:$0xff]  ;;  %s2274_s6 = smov [#allocation6]  }
0x1965   :  { %s1959_s22 = sshll.u32 %s2274_s6, 4  ;;  %s1960_s22 = int_to_ptr.vmem [resolvable:$true] %s1959_s22 }
0x1966   :  { %s2237_s23 = scalar_lea.vmem %s1960_s22, 256  ;;  %p2242_p2 = scmp.lt.s32.totalorder %s1960_s22, %s1960_s22 }
0x1967   :  { %p2238_p1 = scmp.ne.s32.totalorder %s1960_s22, %s2237_s23  ;;  %p2243_p3 = scmp.lt.s32.totalorder %s2237_s23, %s2237_s23 }
0x1969   :  { %p2244_p4 = por %p2243_p3, %p2242_p2 }
0x196b   :  { %p2245_p5 = pnand %p2244_p4, %p2238_p1 }
0x1a16   :  { %v2052_v9 = vpop.f32.mrf.mxu1 }
0x1a17   :  { %v1933_v10 = vadd.f32 %v2052_v9, %v2033_v8 }
0x1a18   :  { %v1927_v11 = vpop.f32.mrf.mxu1 }
0x1a19   :  { %1938 = vst.msk [vmem:[#allocation6 + $0x8] sm:$0xff] %vm1936_vm5, %v1933_v10  ;;  %v1928_v0 = vadd.f32 %v2033_v8, %v1927_v11 }
0x1a1b   :  { %1937 = vst.msk [vmem:[#allocation6] sm:$0xff] %vm1936_vm5, %v1928_v0 }
0x1a1c   :  { %2248 = shalt.err (!%p2245_p5)
}
0x1a1d   :  { %s2275_s7 = smov 128   ;;  %s2276_s11 = smov 8  }
0x1a1e   :  { %1965 = dma.vmem_to_hbm [thread:$0]  %s1960_s22, 256, %s2775_s5, [#allocation5], %s2275_s7, %s2275_s7, %s2276_s11  }
0x1a1f   :  { %2259 = dma.done.wait [#allocation5], 256  }
0x1a20   :  { %2260 = vsyncadd [#allocation5], 4294967040 }
0x1a21   :  { %2261 = dma.done.wait [#allocation8], 128  }
0x1a22   :  { %2262 = vsyncadd [#allocation8], 4294967168 }
0x1a23   :  { %1999 = vsyncpa [#allocation4], 1 }
0x1a24   :  { %2000 = vsyncpa [#allocation5], 1 }
0x1a25   :  { %2001 = vsyncpa [#allocation8], 1 }

</bundles_post_ra>
